<compile_context>
chip_gen: v6e
topology: v6e:2x2x1
jax: 0.10.0
libtpu: 0.0.40
codegen_flags: <defaults>
</compile_context>

<pallas_src>
import jax
import jax.numpy as jnp
from jax.experimental import pallas as pl
from jax.experimental.pallas import tpu as pltpu


K_IN = 784     # 28*28 flattened MNIST
K_PAD = 896    # 7*128 lane-aligned reduction dim (col 784 = constant 1 for the bias)
H1 = 256
H2 = 64
HEAD = 128     # fused head width: [cls 0:10 | domain-hidden 10:74 | zero pad]
N_CLS = 10
N_DOM = 2


def dann_kernel(x_ref, w1_ref, w2_ref, b2_ref, wh_ref, bh_ref, wf_ref, bf_ref,
                out_ref):
    # ---- feature extractor (BN + bias folded into weights by the wrapper) ----
    x = x_ref[...]                                                       # (TM, 896) bf16
    h1 = jnp.dot(x, w1_ref[...], preferred_element_type=jnp.float32)    # (TM, 256)
    h1 = jnp.maximum(h1, 0.0)

    feat = jnp.dot(h1.astype(jnp.bfloat16), w2_ref[...],
                   preferred_element_type=jnp.float32) + b2_ref[...]    # (TM, 128)
    feat = jnp.maximum(feat, 0.0)                                       # cols 64: are 0

    # ---- fused heads: one (128,128) matmul gives classifier logits (cols 0:10)
    #      and the domain hidden layer (cols 10:74) in a lane-dense slab ----
    head = jnp.dot(feat.astype(jnp.bfloat16), wh_ref[...],
                   preferred_element_type=jnp.float32) + bh_ref[...]    # (TM, 128)

    # ReLU everywhere is safe: wf only reads the domain-hidden columns, and the
    # classifier logits are taken from (pre-ReLU) `head` by the final select.
    act = jnp.maximum(head, 0.0)
    domf = jnp.dot(act.astype(jnp.bfloat16), wf_ref[...],
                   preferred_element_type=jnp.float32) + bf_ref[...]    # cols 10:12 = dom

    lane = jax.lax.broadcasted_iota(jnp.int32, head.shape, 1)
    out_ref[...] = jnp.where(lane < N_CLS, head, domf)                  # [cls | dom | 0]


def _fold_bn(gamma, beta, mean, var, eps=1e-5):
    scale = gamma * jax.lax.rsqrt(var + eps)
    shift = beta - mean * scale
    return scale, shift


def _fold_params(params):
    """Fold BN(eval) + biases into padded, lane-aligned bf16 weight matrices."""
    (w1, b1, bn1), (w2, b2, bn2), (wc, bc), (wd1, bd1, bnd), (wd2, bd2) = params

    # Layer 1: 784->256, BN256.  Bias lives in row 784 (x col 784 is constant 1).
    s1, t1 = _fold_bn(*bn1)
    w1p = jnp.zeros((K_PAD, H1), jnp.float32)
    w1p = w1p.at[:K_IN].set(w1 * s1[None, :]).at[K_IN].set(b1 * s1 + t1)

    # Layer 2: 256->64, BN64, zero-padded to 128 output lanes.
    s2, t2 = _fold_bn(*bn2)
    w2p = jnp.zeros((H1, HEAD), jnp.float32).at[:, :H2].set(w2 * s2[None, :])
    b2p = jnp.zeros((1, HEAD), jnp.float32).at[0, :H2].set(b2 * s2 + t2)

    # Fused head: classifier (64->10) in cols 0:10, domain-hidden (64->64, BN64)
    # in cols 10:74, zeros elsewhere.
    sd, td = _fold_bn(*bnd)
    whp = jnp.zeros((HEAD, HEAD), jnp.float32)
    whp = whp.at[:H2, :N_CLS].set(wc).at[:H2, N_CLS:N_CLS + H2].set(wd1 * sd[None, :])
    bhp = jnp.zeros((1, HEAD), jnp.float32)
    bhp = bhp.at[0, :N_CLS].set(bc).at[0, N_CLS:N_CLS + H2].set(bd1 * sd + td)

    # Final domain layer (64->2) mapped into cols 10:12 of the output slab.
    wfp = jnp.zeros((HEAD, HEAD), jnp.float32)
    wfp = wfp.at[N_CLS:N_CLS + H2, N_CLS:N_CLS + N_DOM].set(wd2)
    bfp = jnp.zeros((1, HEAD), jnp.float32).at[0, N_CLS:N_CLS + N_DOM].set(bd2)

    bf16 = jnp.bfloat16
    return (w1p.astype(bf16), w2p.astype(bf16), b2p,
            whp.astype(bf16), bhp, wfp.astype(bf16), bfp)


def dann_forward(x_nchw, params, *, tm=128):
    B = x_nchw.shape[0]
    x = x_nchw.reshape(B, -1).astype(jnp.float32)          # nn.Flatten() on NCHW

    bp = pl.cdiv(B, tm) * tm                               # pad batch to tile multiple
    x_pad = jnp.zeros((bp, K_PAD), jnp.float32)
    x_pad = x_pad.at[:B, :K_IN].set(x).at[:, K_IN].set(1.0)
    x_pad = x_pad.astype(jnp.bfloat16)

    w1p, w2p, b2p, whp, bhp, wfp, bfp = _fold_params(params)

    grid = (bp // tm,)
    const = lambda i: (0, 0)                               # weights resident across tiles

    flops = int(2 * bp * (K_PAD * H1 + H1 * HEAD + 2 * HEAD * HEAD))
    bytes_accessed = int(
        bp * K_PAD * 2 + bp * HEAD * 4                     # x in, out slab
        + (K_PAD * H1 + H1 * HEAD + 2 * HEAD * HEAD) * 2   # bf16 weights
        + 3 * HEAD * 4)                                    # f32 biases

    out = pl.pallas_call(
        dann_kernel,
        out_shape=jax.ShapeDtypeStruct((bp, HEAD), jnp.float32),
        grid_spec=pltpu.PrefetchScalarGridSpec(
            num_scalar_prefetch=0,
            grid=grid,
            in_specs=[
                pl.BlockSpec((tm, K_PAD), lambda i: (i, 0)),   # x tile (pipelined)
                pl.BlockSpec((K_PAD, H1), const),
                pl.BlockSpec((H1, HEAD), const),
                pl.BlockSpec((1, HEAD), const),
                pl.BlockSpec((HEAD, HEAD), const),
                pl.BlockSpec((1, HEAD), const),
                pl.BlockSpec((HEAD, HEAD), const),
                pl.BlockSpec((1, HEAD), const),
            ],
            out_specs=pl.BlockSpec((tm, HEAD), lambda i: (i, 0)),
        ),
        compiler_params=pltpu.CompilerParams(
            dimension_semantics=("parallel",)),
        cost_estimate=pl.CostEstimate(flops=flops, transcendentals=0,
                                      bytes_accessed=bytes_accessed),
    )(x_pad, w1p, w2p, b2p, whp, bhp, wfp, bfp)

    cls_logits = out[:B, :N_CLS]
    dom_logits = out[:B, N_CLS:N_CLS + N_DOM]
    return cls_logits, dom_logits


def make_params(key):
    ks = jax.random.split(key, 16)

    def lin(k_w, k_b, fan_in, fan_out):
        w = jax.random.normal(k_w, (fan_in, fan_out), jnp.float32) * 0.02
        b = jax.random.normal(k_b, (fan_out,), jnp.float32) * 0.01
        return w, b

    def bn(k, n):
        k1, k2, k3, k4 = jax.random.split(k, 4)
        gamma = 1.0 + 0.1 * jax.random.normal(k1, (n,), jnp.float32)
        beta = 0.1 * jax.random.normal(k2, (n,), jnp.float32)
        mean = 0.1 * jax.random.normal(k3, (n,), jnp.float32)
        var = jnp.abs(1.0 + 0.1 * jax.random.normal(k4, (n,), jnp.float32))
        return (gamma, beta, mean, var)

    w1, b1 = lin(ks[0], ks[1], 784, 256)
    bn1 = bn(ks[2], 256)
    w2, b2 = lin(ks[3], ks[4], 256, 64)
    bn2 = bn(ks[5], 64)
    wc, bc = lin(ks[6], ks[7], 64, 10)
    wd1, bd1 = lin(ks[8], ks[9], 64, 64)
    bnd = bn(ks[10], 64)
    wd2, bd2 = lin(ks[11], ks[12], 64, 2)
    return ((w1, b1, bn1), (w2, b2, bn2), (wc, bc), (wd1, bd1, bnd), (wd2, bd2))


def dann_reference_f32(x_nchw, params):
    """Eval-mode PyTorch semantics in full f32 (loose check vs bf16 kernel)."""
    (w1, b1, bn1), (w2, b2, bn2), (wc, bc), (wd1, bd1, bnd), (wd2, bd2) = params
    x = x_nchw.reshape(x_nchw.shape[0], -1).astype(jnp.float32)

    def bn_eval(h, bn):
        g, beta, m, v = bn
        return (h - m) * (g * jax.lax.rsqrt(v + 1e-5)) + beta

    h = jnp.maximum(bn_eval(x @ w1 + b1, bn1), 0.0)
    feat = jnp.maximum(bn_eval(h @ w2 + b2, bn2), 0.0)
    cls = feat @ wc + bc
    d = jnp.maximum(bn_eval(feat @ wd1 + bd1, bnd), 0.0)
    dom = d @ wd2 + bd2
    return cls, dom


def dann_reference_emulated(x_nchw, params):
    """Pure-JAX replica of the exact folded bf16 math the kernel performs."""
    B = x_nchw.shape[0]
    x = x_nchw.reshape(B, -1).astype(jnp.float32)
    x_pad = jnp.zeros((B, K_PAD), jnp.float32).at[:, :K_IN].set(x).at[:, K_IN].set(1.0)
    x_pad = x_pad.astype(jnp.bfloat16)
    w1p, w2p, b2p, whp, bhp, wfp, bfp = _fold_params(params)
    h1 = jnp.maximum(jnp.dot(x_pad, w1p, preferred_element_type=jnp.float32), 0.0)
    feat = jnp.maximum(jnp.dot(h1.astype(jnp.bfloat16), w2p,
                               preferred_element_type=jnp.float32) + b2p, 0.0)
    head = jnp.dot(feat.astype(jnp.bfloat16), whp,
                   preferred_element_type=jnp.float32) + bhp
    act = jnp.maximum(head, 0.0)
    domf = jnp.dot(act.astype(jnp.bfloat16), wfp,
                   preferred_element_type=jnp.float32) + bfp
    return head[:, :N_CLS], domf[:, N_CLS:N_CLS + N_DOM]


if __name__ == "__main__":
    key = jax.random.PRNGKey(0)
    k_x, k_p = jax.random.split(key)

    B = 256   # two 128-row batch tiles -> the "parallel" axis can shard across cores
    x = jax.random.normal(k_x, (B, 1, 28, 28), jnp.float32)  # MNIST-shaped NCHW input
    params = make_params(k_p)

    cls_logits, dom_logits = dann_forward(x, params, tm=128)
    jax.block_until_ready((cls_logits, dom_logits))
    assert cls_logits.shape == (B, 10) and dom_logits.shape == (B, 2)

    # Tight check vs a pure-JAX replica of the identical folded bf16 computation.
    cls_e, dom_e = dann_reference_emulated(x, params)
    assert jnp.allclose(cls_logits, cls_e, atol=5e-3, rtol=5e-3)
    assert jnp.allclose(dom_logits, dom_e, atol=5e-3, rtol=5e-3)

    # Loose check vs full-f32 eval-mode semantics (bf16 rounding is the only delta).
    cls_r, dom_r = dann_reference_f32(x, params)
    assert jnp.allclose(cls_logits, cls_r, atol=5e-2, rtol=5e-2)
    assert jnp.allclose(dom_logits, dom_r, atol=5e-2, rtol=5e-2)

    print("KERNEL_OK")
</pallas_src>

<mosaic_0001>
module attributes {stable_mosaic.version = 11 : i64} {
  func.func @dann_kernel(%arg0: i32, %arg1: memref<128x896xbf16, #tpu.memory_space<vmem>>, %arg2: memref<896x256xbf16, #tpu.memory_space<vmem>>, %arg3: memref<256x128xbf16, #tpu.memory_space<vmem>>, %arg4: memref<1x128xf32, #tpu.memory_space<vmem>>, %arg5: memref<128x128xbf16, #tpu.memory_space<vmem>>, %arg6: memref<1x128xf32, #tpu.memory_space<vmem>>, %arg7: memref<128x128xbf16, #tpu.memory_space<vmem>>, %arg8: memref<1x128xf32, #tpu.memory_space<vmem>>, %arg9: memref<128x128xf32, #tpu.memory_space<vmem>>) attributes {dimension_semantics = [#tpu.dimension_semantics<parallel>], iteration_bounds = array<i64: 2>, scalar_prefetch = 0 : i64, scratch_operands = 0 : i64, tpu.core_type = #tpu.core_type<tc>, window_params = [{transform_indices = @transform_0, window_bounds = array<i64: 128, 896>}, {pipeline_mode = #tpu.pipeline_mode<synchronous>, transform_indices = @transform_1, window_bounds = array<i64: 896, 256>}, {pipeline_mode = #tpu.pipeline_mode<synchronous>, transform_indices = @transform_2, window_bounds = array<i64: 256, 128>}, {pipeline_mode = #tpu.pipeline_mode<synchronous>, transform_indices = @transform_3, window_bounds = array<i64: 1, 128>}, {pipeline_mode = #tpu.pipeline_mode<synchronous>, transform_indices = @transform_4, window_bounds = array<i64: 128, 128>}, {pipeline_mode = #tpu.pipeline_mode<synchronous>, transform_indices = @transform_5, window_bounds = array<i64: 1, 128>}, {pipeline_mode = #tpu.pipeline_mode<synchronous>, transform_indices = @transform_6, window_bounds = array<i64: 128, 128>}, {pipeline_mode = #tpu.pipeline_mode<synchronous>, transform_indices = @transform_7, window_bounds = array<i64: 1, 128>}, {transform_indices = @transform_8, window_bounds = array<i64: 128, 128>}]} {
    %c0 = arith.constant 0 : index
    %c0_0 = arith.constant 0 : index
    %0 = vector.load %arg1[%c0, %c0_0] : memref<128x896xbf16, #tpu.memory_space<vmem>>, vector<128x896xbf16>
    %c0_1 = arith.constant 0 : index
    %c0_2 = arith.constant 0 : index
    %1 = vector.load %arg2[%c0_1, %c0_2] : memref<896x256xbf16, #tpu.memory_space<vmem>>, vector<896x256xbf16>
    %cst = arith.constant dense<0.000000e+00> : vector<128x256xf32>
    %2 = tpu.matmul %0, %1, %cst {dimension_numbers = #tpu.dot_dimension_numbers<[1], [0], [0], [1], [0, 0, 1, 1], [], []>} : vector<128x896xbf16>, vector<896x256xbf16>, vector<128x256xf32> -> vector<128x256xf32>
    %cst_3 = arith.constant 0.000000e+00 : f32
    %3 = vector.broadcast %cst_3 : f32 to vector<128x256xf32>
    %4 = arith.maximumf %2, %3 : vector<128x256xf32>
    %5 = arith.truncf %4 : vector<128x256xf32> to vector<128x256xbf16>
    %c0_4 = arith.constant 0 : index
    %c0_5 = arith.constant 0 : index
    %6 = vector.load %arg3[%c0_4, %c0_5] : memref<256x128xbf16, #tpu.memory_space<vmem>>, vector<256x128xbf16>
    %cst_6 = arith.constant dense<0.000000e+00> : vector<128x128xf32>
    %7 = tpu.matmul %5, %6, %cst_6 {dimension_numbers = #tpu.dot_dimension_numbers<[1], [0], [0], [1], [0, 0, 1, 1], [], []>} : vector<128x256xbf16>, vector<256x128xbf16>, vector<128x128xf32> -> vector<128x128xf32>
    %c0_7 = arith.constant 0 : index
    %c0_8 = arith.constant 0 : index
    %8 = vector.load %arg4[%c0_7, %c0_8] : memref<1x128xf32, #tpu.memory_space<vmem>>, vector<1x128xf32>
    %9 = vector.broadcast %8 : vector<1x128xf32> to vector<128x128xf32>
    %10 = arith.addf %7, %9 : vector<128x128xf32>
    %cst_9 = arith.constant 0.000000e+00 : f32
    %11 = vector.broadcast %cst_9 : f32 to vector<128x128xf32>
    %12 = arith.maximumf %10, %11 : vector<128x128xf32>
    %13 = arith.truncf %12 : vector<128x128xf32> to vector<128x128xbf16>
    %c0_10 = arith.constant 0 : index
    %c0_11 = arith.constant 0 : index
    %14 = vector.load %arg5[%c0_10, %c0_11] : memref<128x128xbf16, #tpu.memory_space<vmem>>, vector<128x128xbf16>
    %cst_12 = arith.constant dense<0.000000e+00> : vector<128x128xf32>
    %15 = tpu.matmul %13, %14, %cst_12 {dimension_numbers = #tpu.dot_dimension_numbers<[1], [0], [0], [1], [0, 0, 1, 1], [], []>} : vector<128x128xbf16>, vector<128x128xbf16>, vector<128x128xf32> -> vector<128x128xf32>
    %c0_13 = arith.constant 0 : index
    %c0_14 = arith.constant 0 : index
    %16 = vector.load %arg6[%c0_13, %c0_14] : memref<1x128xf32, #tpu.memory_space<vmem>>, vector<1x128xf32>
    %17 = vector.broadcast %16 : vector<1x128xf32> to vector<128x128xf32>
    %18 = arith.addf %15, %17 : vector<128x128xf32>
    %cst_15 = arith.constant 0.000000e+00 : f32
    %19 = vector.broadcast %cst_15 : f32 to vector<128x128xf32>
    %20 = arith.maximumf %18, %19 : vector<128x128xf32>
    %21 = arith.truncf %20 : vector<128x128xf32> to vector<128x128xbf16>
    %c0_16 = arith.constant 0 : index
    %c0_17 = arith.constant 0 : index
    %22 = vector.load %arg7[%c0_16, %c0_17] : memref<128x128xbf16, #tpu.memory_space<vmem>>, vector<128x128xbf16>
    %cst_18 = arith.constant dense<0.000000e+00> : vector<128x128xf32>
    %23 = tpu.matmul %21, %22, %cst_18 {dimension_numbers = #tpu.dot_dimension_numbers<[1], [0], [0], [1], [0, 0, 1, 1], [], []>} : vector<128x128xbf16>, vector<128x128xbf16>, vector<128x128xf32> -> vector<128x128xf32>
    %c0_19 = arith.constant 0 : index
    %c0_20 = arith.constant 0 : index
    %24 = vector.load %arg8[%c0_19, %c0_20] : memref<1x128xf32, #tpu.memory_space<vmem>>, vector<1x128xf32>
    %25 = vector.broadcast %24 : vector<1x128xf32> to vector<128x128xf32>
    %26 = arith.addf %23, %25 : vector<128x128xf32>
    %27 = tpu.iota {dimensions = array<i32: 1>} : vector<128x128xi32>
    %c10_i32 = arith.constant 10 : i32
    %28 = vector.broadcast %c10_i32 : i32 to vector<128x128xi32>
    %29 = arith.cmpi slt, %27, %28 : vector<128x128xi32>
    %30 = arith.select %29, %18, %26 : vector<128x128xi1>, vector<128x128xf32>
    %c0_21 = arith.constant 0 : index
    %c0_22 = arith.constant 0 : index
    %31 = vector.load %arg9[%c0_21, %c0_22] : memref<128x128xf32, #tpu.memory_space<vmem>>, vector<128x128xf32>
    tpu.vector_store %arg9[%c0_21, %c0_22], %30 {strides = array<i32>} : memref<128x128xf32, #tpu.memory_space<vmem>>, vector<128x128xf32>,
    return
  }
  func.func @transform_0(%arg0: i32) -> (i32, i32) {
    %c0_i32 = arith.constant 0 : i32
    %c0_i32_0 = arith.constant 0 : i32
    return %arg0, %c0_i32 : i32, i32
  }
  func.func @transform_1(%arg0: i32) -> (i32, i32) {
    %c0_i32 = arith.constant 0 : i32
    %c0_i32_0 = arith.constant 0 : i32
    %c0_i32_1 = arith.constant 0 : i32
    return %c0_i32, %c0_i32_0 : i32, i32
  }
  func.func @transform_2(%arg0: i32) -> (i32, i32) {
    %c0_i32 = arith.constant 0 : i32
    %c0_i32_0 = arith.constant 0 : i32
    %c0_i32_1 = arith.constant 0 : i32
    return %c0_i32, %c0_i32_0 : i32, i32
  }
  func.func @transform_3(%arg0: i32) -> (i32, i32) {
    %c0_i32 = arith.constant 0 : i32
    %c0_i32_0 = arith.constant 0 : i32
    %c0_i32_1 = arith.constant 0 : i32
    return %c0_i32, %c0_i32_0 : i32, i32
  }
  func.func @transform_4(%arg0: i32) -> (i32, i32) {
    %c0_i32 = arith.constant 0 : i32
    %c0_i32_0 = arith.constant 0 : i32
    %c0_i32_1 = arith.constant 0 : i32
    return %c0_i32, %c0_i32_0 : i32, i32
  }
  func.func @transform_5(%arg0: i32) -> (i32, i32) {
    %c0_i32 = arith.constant 0 : i32
    %c0_i32_0 = arith.constant 0 : i32
    %c0_i32_1 = arith.constant 0 : i32
    return %c0_i32, %c0_i32_0 : i32, i32
  }
  func.func @transform_6(%arg0: i32) -> (i32, i32) {
    %c0_i32 = arith.constant 0 : i32
    %c0_i32_0 = arith.constant 0 : i32
    %c0_i32_1 = arith.constant 0 : i32
    return %c0_i32, %c0_i32_0 : i32, i32
  }
  func.func @transform_7(%arg0: i32) -> (i32, i32) {
    %c0_i32 = arith.constant 0 : i32
    %c0_i32_0 = arith.constant 0 : i32
    %c0_i32_1 = arith.constant 0 : i32
    return %c0_i32, %c0_i32_0 : i32, i32
  }
  func.func @transform_8(%arg0: i32) -> (i32, i32) {
    %c0_i32 = arith.constant 0 : i32
    %c0_i32_0 = arith.constant 0 : i32
    return %arg0, %c0_i32 : i32, i32
  }
}

</mosaic_0001>

<bundles_post_ra>
// kernel: tpu_custom_call.1
= control target key start
LH: loop header
LB: loop body
LE: loop exit
PB: predicated region body
PF: predicated region fallthrough
CT: control target
= control target key end

     0   :  { %s4298_s0 = inlined_call_operand.hbm [shape: bf16[256,896], index: 0, kind: input, shape index: {}]   ;;  %s4299_s1 = inlined_call_operand.hbm [shape: bf16[896,256], index: 1, kind: input, shape index: {}]   ;;  %s4300_s2 = inlined_call_operand.hbm [shape: bf16[256,128], index: 2, kind: input, shape index: {}]   ;;  %s4301_s3 = inlined_call_operand.vmem [shape: f32[1,128], index: 3, kind: input, shape index: {}]   ;;  %s4302_s4 = inlined_call_operand.hbm [shape: bf16[128,128], index: 4, kind: input, shape index: {}]   ;;  %s4303_s5 = inlined_call_operand.vmem [shape: f32[1,128], index: 5, kind: input, shape index: {}]   ;;  %s4304_s6 = inlined_call_operand.hbm [shape: bf16[128,128], index: 6, kind: input, shape index: {}]   ;;  %s4305_s7 = inlined_call_operand.vmem [shape: f32[1,128], index: 7, kind: input, shape index: {}]   ;;  %s4306_s8 = inlined_call_operand.hbm [shape: f32[256,128], index: 8, kind: output, shape index: {}]  }
   0x1   :  { %4311 = sst [smem:[#allocation20_spill]] %s4299_s1 }
   0x2   :  { %4312 = sst [smem:[#allocation21_spill]] %s4300_s2 }
   0x3   :  { %13 = vsyncpa [#allocation3], 0 }
   0x4   :  { %15 = vsyncpa [#allocation3 + $0x1], 0 }
   0x5   :  { %16 = vsyncpa [#allocation6], 0 }
   0x6   :  { %17 = vsyncpa [#allocation9], 0 }
   0x7   :  { %18 = vsyncpa [#allocation4], 0 }
   0x8   :  { %20 = vsyncpa [#allocation4 + $0x1], 0  ;;  %s3716_s27 = smov 0   ;;  %s3718_s28 = smov 0  }
   0x9   :  { %s3720_s29 = smov 0   ;;  %s3722_s30 = smov 0  }
   0xa LB: > { %s3737_s9 = sadd.s32 4294967295, %s3654_s30   ;;  %s2686_s10 = sadd.s32 4294967294, %s3654_s30   ;;  %s3654_s30 = sphi %s3722_s30, %s4342_s30   ;;  %s3650_s29 = sphi %s3720_s29, %s4341_s29   ;;  %s3646_s28 = sphi %s3718_s28, %s4340_s28   ;;  %s3642_s27 = sphi %s3716_s27, %s4339_s27  }
   0xb   : > { %p46_p0 = scmp.ne.s32.totalorder %s3646_s28, %s3642_s27  ;;  %p4307_p1 = scmp.eq.s32.totalorder %s3737_s9, 0 }
   0xc   : > { %p223_p3 = scmp.eq.s32.totalorder %s2686_s10, 1  ;;  %p2687_p5 = scmp.ge.s32.totalorder %s3654_s30, 1 }
   0xd   : > { %p3746_p4 = por %p4307_p1, %p46_p0  ;;  %p230_p7 = scmp.lt.s32.totalorder %s3654_s30, 3 }
   0xe   : > { %p3751_p6 = por %p223_p3, %p46_p0  ;;  %s3656_s14 = smov [#allocation5]  }
   0xf   : > { %s4313_s11 = scalar_select %p3746_p4, 1, 0 }
  0x10   : > { %s4314_s12 = scalar_select %p3751_p6, 1, 0 }
  0x11   : > { %p3756_p8 = pnand %p2687_p5, %p230_p7  ;;  %s242_s15 = sshll.u32 %s3656_s14, 4  ;;  %s243_s15 = int_to_ptr.vmem [resolvable:$true] %s242_s15 }
  0x12   : > { %s3657_s17 = smov [#allocation8]   ;;  %s3461_s19 = scalar_lea.vmem %s243_s15, 14336 }
  0x13   : > { %s4315_s13 = scalar_select %p3756_p8, 1, 0 }
  0x14   : > { %p3094_p9 = pneg %p3756_p8  ;;  %s271_s18 = sshll.u32 %s3657_s17, 4  ;;  %s272_s18 = int_to_ptr.vmem [resolvable:$true] %s271_s18 }
  0x15   : > { %p3462_p13 = scmp.ne.s32.totalorder %s243_s15, %s3461_s19  ;;  %p3469_p5 = scmp.lt.s32.totalorder %s243_s15, %s243_s15 }
  0x16   : > { %p3765_p11 = pnand %p3094_p9, %p4307_p1  ;;  %p3470_p7 = scmp.lt.s32.totalorder %s3461_s19, %s3461_s19 }
  0x18   : > { %p3452_p12 = pneg %p3765_p11  ;;  %p3471_p10 = por %p3470_p7, %p3469_p5 }
  0x1a   : > { %p3464_p0 = pnand %p3462_p13, %p3452_p12 }
  0x1c   : > { %p3465_p3 = pneg %p3464_p0 }
  0x1e   : > { %p3472_p2 = pnand %p3471_p10, %p3465_p3 }
  0x20   : > { %3475 = shalt.err (!%p3472_p2)
}
  0x21   : > { %s3658_s20 = smov 128   ;;  %s3659_s21 = smov 8  }
  0x22   : > { %s4317_s1 = sld [smem:[#allocation20_spill]]  ;;  %s3660_s24 = smov [#allocation7]  }
  0x23   : > { %s255_s25 = sshll.u32 %s3660_s24, 4  ;;  %s3487_s26 = scalar_lea.vmem %s272_s18, 1024  ;;  %s256_s25 = int_to_ptr.vmem [resolvable:$true] %s255_s25 }
  0x24   : > { %p3488_p9 = scmp.ne.s32.totalorder %s272_s18, %s3487_s26  ;;  %p3495_p10 = scmp.lt.s32.totalorder %s272_s18, %s272_s18 }
  0x25   : > { %p3496_p2 = scmp.lt.s32.totalorder %s3487_s26, %s3487_s26 }
  0x26   : > { %p3490_p13 = pnand %p3488_p9, %p3452_p12 }
  0x27   : > { %p3497_p3 = por %p3496_p2, %p3495_p10 }
  0x28   : > { %3097 = dma.hbm_to_vmem [thread:$0]  (!%p3765_p11), %s4317_s1, 14336, %s243_s15, [#allocation6], %s3658_s20, %s3658_s20, %s3659_s21  }
  0x29   : > { %p3491_p0 = pneg %p3490_p13 }
  0x2b   : > { %p3498_p5 = pnand %p3497_p3, %p3491_p0 }
  0x2d   : > { %3501 = shalt.err (!%p3498_p5)
}
  0x2e   : > { %s3661_s10 = smov 64   ;;  %s3662_s14 = smov 4  }
  0x2f   : > { %3103 = dma.hbm_to_vmem [thread:$0]  (!%p3765_p11), %s4302_s4, 1024, %s272_s18, [#allocation9], %s3661_s10, %s3661_s10, %s3662_s14  }
  0x30   : > { %s3513_s19 = scalar_lea.vmem %s256_s25, 2048  ;;  %p3521_p1 = scmp.lt.s32.totalorder %s256_s25, %s256_s25 }
  0x31   : > { %p3514_p7 = scmp.ne.s32.totalorder %s256_s25, %s3513_s19  ;;  %p3522_p10 = scmp.lt.s32.totalorder %s3513_s19, %s3513_s19 }
  0x33   : > { %p3516_p9 = pnand %p3514_p7, %p3452_p12  ;;  %p3523_p0 = por %p3522_p10, %p3521_p1 }
  0x35   : > { %p3517_p13 = pneg %p3516_p9 }
  0x37   : > { %p3524_p2 = pnand %p3523_p0, %p3517_p13 }
  0x39   : > { %3527 = shalt.err (!%p3524_p2)
}
  0x3a   : > { %s4318_s2 = sld [smem:[#allocation21_spill]]  ;;  %s3663_s18 = smov [#allocation10]  }
  0x3b   : > { %s287_s22 = sshll.u32 %s3663_s18, 4  ;;  %s288_s22 = int_to_ptr.vmem [resolvable:$true] %s287_s22 }
  0x3c   : > { %s3539_s23 = scalar_lea.vmem %s288_s22, 1024  ;;  %p3547_p9 = scmp.lt.s32.totalorder %s288_s22, %s288_s22 }
  0x3d   : > { %p3540_p3 = scmp.ne.s32.totalorder %s288_s22, %s3539_s23  ;;  %p3548_p1 = scmp.lt.s32.totalorder %s3539_s23, %s3539_s23 }
  0x3f   : > { %p3542_p5 = pnand %p3540_p3, %p3452_p12  ;;  %p3549_p13 = por %p3548_p1, %p3547_p9 }
  0x40   : > { %3100 = dma.hbm_to_vmem [thread:$0]  (!%p3765_p11), %s4318_s2, 2048, %s256_s25, [#allocation6], %s3661_s10, %s3661_s10, %s3662_s14  }
  0x41   : > { %p3543_p7 = pneg %p3542_p5 }
  0x43   : > { %p3550_p10 = pnand %p3549_p13, %p3543_p7 }
  0x45   : > { %3553 = shalt.err (!%p3550_p10)
}
  0x46   : > { %3106 = dma.hbm_to_vmem [thread:$0]  (!%p3765_p11), %s4304_s6, 1024, %s288_s22, [#allocation9], %s3661_s10, %s3661_s10, %s3662_s14  }
  0x47   : > { %s3804_s25 = sadd.s32 1, %s3654_s30   ;;  %s33_s15 = sadd.s32 1, %s3650_s29 }
  0x48   : > { %s30_s16 = ssub.s32 %s3654_s30, %s3804_s25  ;;  %p40_p12 = scmp.ne.s32.totalorder %s3650_s29, %s3646_s28 }
  0x49   : > { %p31_p0 = scmp.eq.s32.totalorder %s30_s16, 0  ;;  %p41_p2 = scmp.eq.s32.totalorder %s3654_s30, 0 }
  0x4a   : > { %p4319_p3 = scmp.eq.s32.totalorder %s3737_s9, 1  ;;  %p3119_p7 = scmp.lt.s32.totalorder %s3654_s30, 2 }
  0x4b   : > { %s3820_s19 = scalar_select %p31_p0, %s3650_s29, %s33_s15  }
  0x4c   : > { %p3814_p5 = por %p4319_p3, %p40_p12  ;;  %p42_p9 = por %p41_p2, %p40_p12 }
  0x4d   : > { %s304_s20 = sand.u32 1, %s3650_s29   ;;  %s3072_s10 = smul.u32 7168, %s3654_s30 }
  0x4e   : > { %s4320_s17 = scalar_select %p3814_p5, 1, 0 }
  0x4f   : > { %s3071_s21 = smul.u32 448, %s304_s20  ;;  %p3824_p11 = pnand %p3119_p7, %p42_p9 }
  0x50   : > { %s3831_s23 = scalar_lea.hbm %s4298_s0, %s3072_s10  ;;  %s3835_s15 = scalar_lea.sflag [#allocation3], %s304_s20 }
  0x51   : > { %s308_s24 = scalar_lea.vmem [#allocation2], %s3071_s21  ;;  %s3554_s16 = scalar_lea.hbm %s3831_s23, 7168 }
  0x52   : > { %s316_s26 = sshll.u32 %s308_s24, 4  ;;  %p3555_p1 = scmp.ne.s32.totalorder %s3831_s23, %s3554_s16  ;;  %s3833_s26 = int_to_ptr.vmem [resolvable:$true] %s316_s26 }
  0x53   : > { %p3556_p13 = pneg %p3824_p11  ;;  %s3559_s10 = scalar_lea.hbm %s4298_s0, 14336 }
  0x54   : > { %p3560_p0 = scmp.lt.s32.totalorder %s3831_s23, %s4298_s0  ;;  %p3561_p2 = scmp.lt.s32.totalorder %s3559_s10, %s3554_s16 }
  0x55   : > { %p3557_p10 = pnand %p3556_p13, %p3555_p1 }
  0x56   : > { %p3562_p3 = por %p3561_p2, %p3560_p0 }
  0x57   : > { %p3558_p12 = pneg %p3557_p10 }
  0x59   : > { %p3563_p7 = pnand %p3562_p3, %p3558_p12 }
  0x5b   : > { %3566 = shalt.err (!%p3563_p7)
}
  0x5c   : > { %s3567_s20 = scalar_lea.vmem %s3833_s26, 7168  ;;  %s3664_s21 = smov [#allocation2]  }
  0x5d   : > { %p3568_p9 = scmp.ne.s32.totalorder %s3833_s26, %s3567_s20  ;;  %s3572_s24 = sshll.u32 %s3664_s21, 4  ;;  %s3573_s24 = int_to_ptr.vmem [resolvable:$false] %s3572_s24 }
  0x5e   : > { %s3574_s1 = scalar_lea.vmem %s3573_s24, 14336  ;;  %p3575_p10 = scmp.lt.s32.totalorder %s3833_s26, %s3573_s24 }
  0x5f   : > { %p3570_p6 = pnand %p3568_p9, %p3556_p13  ;;  %p3576_p5 = scmp.lt.s32.totalorder %s3574_s1, %s3567_s20 }
  0x61   : > { %p3571_p1 = pneg %p3570_p6  ;;  %p3577_p4 = por %p3576_p5, %p3575_p10 }
  0x63   : > { %p3578_p8 = pnand %p3577_p4, %p3571_p1 }
  0x65   : > { %3581 = shalt.err (!%p3578_p8)
}
  0x66   : > { %s3665_s2 = smov 448   ;;  %s3666_s16 = smov 28  }
  0x67   : > { %3110 = dma.hbm_to_vmem [thread:$0]  (!%p3824_p11), %s3831_s23, 7168, %s3833_s26, %s3835_s15, %s3665_s2, %s3665_s2, %s3666_s16  }
  0x68   : > { %p4322_p13 = scmp.ne.s32.totalorder %s4315_s13, 0 }
  0x6a   : > { %328 = sbr.rel (%p4322_p13) target bundleno = 1144 (0x478), region = 52 }
  0x6f   : > { %s3859_s18 = sand.u32 1, %s3646_s28   ;;  %p4323_p4 = scmp.ne.s32.totalorder %s4313_s11, 0 }
  0x70   : > { %s3073_s10 = smul.u32 448, %s3859_s18  ;;  %s331_s22 = scalar_lea.sflag [#allocation3], %s3859_s18 }
  0x72   : > { %s3863_s20 = scalar_lea.vmem [#allocation2], %s3073_s10 }
  0x73   : > { %3625 = dma.done.wait (%p4323_p4), %s331_s22, 7168  }
  0x74   : > { %3627 = vsyncadd (%p4323_p4), %s331_s22, 4294960128  ;;  %p4324_p6 = scmp.eq.s32.totalorder %s3737_s9, 0 }
  0x76   : > { %3629 = dma.done.wait (%p4324_p6), [#allocation6], 16384   ;;  %p4325_p8 = pmov %p4324_p6 }
  0x77   : > { %p4326_p5 = pmov %p4324_p6 }
  0x78   : > { %3631 = vsyncadd (%p4325_p8), [#allocation6], 4294950912 }
  0x79   : > { %3633 = dma.done.wait (%p4326_p5), [#allocation9], 2048   ;;  %p4327_p11 = pmov %p4326_p5 }
  0x7a   : > { %v3170_v0 = vld [vmem:[#allocation5 + $0x74] ss:$8 sps:$4 sm:$0xff]   ;;  %v3174_v2 = vld [vmem:[#allocation5 + $0x70] ss:$8 sps:$4 sm:$0xff]   ;;  %v3176_v4 = vld [vmem:[#allocation5 + $0x64] ss:$8 sps:$4 sm:$0xff]  }
  0x7b   : > { %3635 = vsyncadd (%p4327_p11), [#allocation9], 4294965248  ;;  %v3172_v1 = vld [vmem:[#allocation5 + $0x174] ss:$8 sps:$4 sm:$0xff]   ;;  %1410 = vmatprep.subr.bf16.mxu0 %v3170_v0  ;;  %v3175_v3 = vld [vmem:[#allocation5 + $0x170] ss:$8 sps:$4 sm:$0xff]  }
  0x7c   : > { %1523 = vmatprep.subr.bf16.mxu1 %v3172_v1  ;;  %1411 = vmatpush1.bf16.msra.mxu0 %v3174_v2  ;;  %v3178_v5 = vld [vmem:[#allocation5 + $0x164] ss:$8 sps:$4 sm:$0xff]   ;;  %v3180_v6 = vld [vmem:[#allocation5 + $0x60] ss:$8 sps:$4 sm:$0xff]   ;;  %v3182_v8 = vld [vmem:[#allocation5 + $0x54] ss:$8 sps:$4 sm:$0xff]  }
  0x7d   : > { %1524 = vmatpush1.bf16.msra.mxu1 %v3175_v3  ;;  %1412 = vmatprep.subr.bf16.mxu0 %v3176_v4  ;;  %v3181_v7 = vld [vmem:[#allocation5 + $0x160] ss:$8 sps:$4 sm:$0xff]   ;;  %v3184_v9 = vld [vmem:[#allocation5 + $0x154] ss:$8 sps:$4 sm:$0xff]   ;;  %v3186_v10 = vld [vmem:[#allocation5 + $0x50] ss:$8 sps:$4 sm:$0xff]  }
  0x7e   : > { %1525 = vmatprep.subr.bf16.mxu1 %v3178_v5  ;;  %v3187_v11 = vld [vmem:[#allocation5 + $0x150] ss:$8 sps:$4 sm:$0xff]   ;;  %v3188_v12 = vld [vmem:[#allocation5 + $0x44] ss:$8 sps:$4 sm:$0xff]   ;;  %v3192_v14 = vld [vmem:[#allocation5 + $0x40] ss:$8 sps:$4 sm:$0xff]  }
  0x7f   : > { %v3190_v13 = vld [vmem:[#allocation5 + $0x144] ss:$8 sps:$4 sm:$0xff]   ;;  %v3193_v15 = vld [vmem:[#allocation5 + $0x140] ss:$8 sps:$4 sm:$0xff]   ;;  %v3194_v16 = vld [vmem:[#allocation5 + $0x34] ss:$8 sps:$4 sm:$0xff]  }
  0x80   : > { %1413 = vmatpush1.bf16.msra.mxu0 %v3180_v6  ;;  %v3196_v17 = vld [vmem:[#allocation5 + $0x134] ss:$8 sps:$4 sm:$0xff]   ;;  %v3198_v18 = vld [vmem:[#allocation5 + $0x30] ss:$8 sps:$4 sm:$0xff]   ;;  %v3200_v20 = vld [vmem:[#allocation5 + $0x24] ss:$8 sps:$4 sm:$0xff]  }
  0x81   : > { %1526 = vmatpush1.bf16.msra.mxu1 %v3181_v7  ;;  %1414 = vmatprep.subr.bf16.mxu0 %v3182_v8  ;;  %v3199_v19 = vld [vmem:[#allocation5 + $0x130] ss:$8 sps:$4 sm:$0xff]   ;;  %v3202_v21 = vld [vmem:[#allocation5 + $0x124] ss:$8 sps:$4 sm:$0xff]   ;;  %v3204_v22 = vld [vmem:[#allocation5 + $0x20] ss:$8 sps:$4 sm:$0xff]  }
  0x82   : > { %1527 = vmatprep.subr.bf16.mxu1 %v3184_v9  ;;  %v3205_v23 = vld [vmem:[#allocation5 + $0x120] ss:$8 sps:$4 sm:$0xff]   ;;  %v3206_v24 = vld [vmem:[#allocation5 + $0x14] ss:$8 sps:$4 sm:$0xff]   ;;  %v3210_v26 = vld [vmem:[#allocation5 + $0x10] ss:$8 sps:$4 sm:$0xff]  }
  0x83   : > { %v3208_v25 = vld [vmem:[#allocation5 + $0x114] ss:$8 sps:$4 sm:$0xff]   ;;  %v3211_v27 = vld [vmem:[#allocation5 + $0x110] ss:$8 sps:$4 sm:$0xff]   ;;  %v3212_v28 = vld [vmem:[#allocation5 + $0x4] ss:$8 sps:$4 sm:$0xff]  }
  0x84   : > { %1415 = vmatpush1.bf16.msra.mxu0 %v3186_v10  ;;  %v3214_v29 = vld [vmem:[#allocation5 + $0x104] ss:$8 sps:$4 sm:$0xff]   ;;  %v3216_v30 = vld [vmem:[#allocation5] ss:$8 sps:$4 sm:$0xff]   ;;  %v3218_v32 = vld [vmem:[#allocation5 + $0xf4] ss:$8 sps:$4 sm:$0xff]  }
  0x85   : > { %1528 = vmatpush1.bf16.msra.mxu1 %v3187_v11  ;;  %1416 = vmatprep.subr.bf16.mxu0 %v3188_v12  ;;  %v3217_v31 = vld [vmem:[#allocation5 + $0x100] ss:$8 sps:$4 sm:$0xff]   ;;  %v3220_v33 = vld [vmem:[#allocation5 + $0x1f4] ss:$8 sps:$4 sm:$0xff]   ;;  %v3222_v34 = vld [vmem:[#allocation5 + $0xf0] ss:$8 sps:$4 sm:$0xff]  }
  0x86   : > { %1529 = vmatprep.subr.bf16.mxu1 %v3190_v13  ;;  %v3223_v35 = vld [vmem:[#allocation5 + $0x1f0] ss:$8 sps:$4 sm:$0xff]   ;;  %v3224_v36 = vld [vmem:[#allocation5 + $0xe4] ss:$8 sps:$4 sm:$0xff]   ;;  %v3228_v38 = vld [vmem:[#allocation5 + $0xe0] ss:$8 sps:$4 sm:$0xff]  }
  0x87   : > { %v3226_v37 = vld [vmem:[#allocation5 + $0x1e4] ss:$8 sps:$4 sm:$0xff]   ;;  %v3229_v39 = vld [vmem:[#allocation5 + $0x1e0] ss:$8 sps:$4 sm:$0xff]   ;;  %v3230_v40 = vld [vmem:[#allocation5 + $0xd4] ss:$8 sps:$4 sm:$0xff]  }
  0x88   : > { %1417 = vmatpush1.bf16.msra.mxu0 %v3192_v14  ;;  %v3232_v41 = vld [vmem:[#allocation5 + $0x1d4] ss:$8 sps:$4 sm:$0xff]   ;;  %v3234_v42 = vld [vmem:[#allocation5 + $0xd0] ss:$8 sps:$4 sm:$0xff]   ;;  %v3236_v44 = vld [vmem:[#allocation5 + $0xc4] ss:$8 sps:$4 sm:$0xff]  }
  0x89   : > { %1530 = vmatpush1.bf16.msra.mxu1 %v3193_v15  ;;  %1418 = vmatprep.subr.bf16.mxu0 %v3194_v16  ;;  %v3235_v43 = vld [vmem:[#allocation5 + $0x1d0] ss:$8 sps:$4 sm:$0xff]   ;;  %v3238_v45 = vld [vmem:[#allocation5 + $0x1c4] ss:$8 sps:$4 sm:$0xff]   ;;  %v3240_v46 = vld [vmem:[#allocation5 + $0xc0] ss:$8 sps:$4 sm:$0xff]  }
  0x8a   : > { %1531 = vmatprep.subr.bf16.mxu1 %v3196_v17  ;;  %v3241_v47 = vld [vmem:[#allocation5 + $0x1c0] ss:$8 sps:$4 sm:$0xff]   ;;  %v3242_v48 = vld [vmem:[#allocation5 + $0xb4] ss:$8 sps:$4 sm:$0xff]   ;;  %v3246_v52 = vld [vmem:[#allocation5 + $0xb0] ss:$8 sps:$4 sm:$0xff]  }
  0x8b   : > { %v3268_v49 = vld [vmem:[%s3863_s20 + $0x4] ss:$28 sps:$4 sm:$0xff]   ;;  %v3244_v50 = vld [vmem:[#allocation5 + $0x1b4] ss:$8 sps:$4 sm:$0xff]   ;;  %v3271_v51 = vld [vmem:[%s3863_s20 + $0xc] ss:$28 sps:$4 sm:$0xff]  }
  0x8c   : > { %1419 = vmatpush1.bf16.msra.mxu0 %v3198_v18  ;;  %1442 = vmatprep.mubr.bf16.mxu0 %v3268_v49  ;;  %v3247_v53 = vld [vmem:[#allocation5 + $0x1b0] ss:$8 sps:$4 sm:$0xff]   ;;  %v3248_v54 = vld [vmem:[#allocation5 + $0xa4] ss:$8 sps:$4 sm:$0xff]   ;;  %v3252_v56 = vld [vmem:[#allocation5 + $0xa0] ss:$8 sps:$4 sm:$0xff]  }
  0x8d   : > { %1532 = vmatpush1.bf16.msra.mxu1 %v3199_v19  ;;  %1420 = vmatprep.subr.bf16.mxu0 %v3200_v20  ;;  %v3250_v55 = vld [vmem:[#allocation5 + $0x1a4] ss:$8 sps:$4 sm:$0xff]   ;;  %v3253_v57 = vld [vmem:[#allocation5 + $0x1a0] ss:$8 sps:$4 sm:$0xff]   ;;  %v3254_v58 = vld [vmem:[#allocation5 + $0x94] ss:$8 sps:$4 sm:$0xff]  }
  0x8e   : > { %1533 = vmatprep.subr.bf16.mxu1 %v3202_v21  ;;  %1555 = vmatprep.mubr.bf16.mxu1 %v3271_v51  ;;  %v3256_v59 = vld [vmem:[#allocation5 + $0x194] ss:$8 sps:$4 sm:$0xff]   ;;  %v3258_v60 = vld [vmem:[#allocation5 + $0x90] ss:$8 sps:$4 sm:$0xff]   ;;  %v3260_v62 = vld [vmem:[#allocation5 + $0x84] ss:$8 sps:$4 sm:$0xff]  }
  0x8f   : > { %v3259_v61 = vld [vmem:[#allocation5 + $0x190] ss:$8 sps:$4 sm:$0xff]   ;;  %v3262_v63 = vld [vmem:[#allocation5 + $0x184] ss:$8 sps:$4 sm:$0xff]   ;;  %v3264_v0 = vld [vmem:[#allocation5 + $0x80] ss:$8 sps:$4 sm:$0xff]  }
  0x90   : > { %1421 = vmatpush1.bf16.msra.mxu0 %v3204_v22  ;;  %v3265_v1 = vld [vmem:[#allocation5 + $0x180] ss:$8 sps:$4 sm:$0xff]   ;;  %v3274_v2 = vld [vmem:[#allocation5 + $0x274] ss:$8 sps:$4 sm:$0xff]   ;;  %v3272_v6 = vld [vmem:[#allocation5 + $0x270] ss:$8 sps:$4 sm:$0xff]  }
  0x91   : > { %1534 = vmatpush1.bf16.msra.mxu1 %v3205_v23  ;;  %1422 = vmatprep.subr.bf16.mxu0 %v3206_v24  ;;  %v3277_v3 = vld [vmem:[#allocation5 + $0x374] ss:$8 sps:$4 sm:$0xff]   ;;  %v3269_v5 = vld [vmem:[%s3863_s20 + $0x8] ss:$28 sps:$4 sm:$0xff]   ;;  %v3275_v7 = vld [vmem:[#allocation5 + $0x370] ss:$8 sps:$4 sm:$0xff]  }
  0x92   : > { %1535 = vmatprep.subr.bf16.mxu1 %v3208_v25  ;;  %v3266_v4 = vld [vmem:[%s3863_s20] ss:$28 sps:$4 sm:$0xff]   ;;  %v3280_v8 = vld [vmem:[#allocation5 + $0x264] ss:$8 sps:$4 sm:$0xff]   ;;  %v3285_v16 = vld [vmem:[%s3863_s20 + $0x38] ss:$28 sps:$4 sm:$0xff]  }
  0x93   : > { %v3281_v9 = vld [vmem:[%s3863_s20 + $0x3c] ss:$28 sps:$4 sm:$0xff]   ;;  %v3283_v10 = vld [vmem:[%s3863_s20 + $0x44] ss:$28 sps:$4 sm:$0xff]   ;;  %v3296_v20 = vld [vmem:[%s3863_s20 + $0x74] ss:$28 sps:$4 sm:$0xff]  }
  0x94   : > { %1423 = vmatpush1.bf16.msra.mxu0 %v3210_v26  ;;  %v3292_v11 = vld [vmem:[#allocation5 + $0x364] ss:$8 sps:$4 sm:$0xff]   ;;  %v3278_v12 = vld [vmem:[#allocation5 + $0x260] ss:$8 sps:$4 sm:$0xff]   ;;  %v3289_v13 = vld [vmem:[#allocation5 + $0x254] ss:$8 sps:$4 sm:$0xff]  }
  0x95   : > { %1536 = vmatpush1.bf16.msra.mxu1 %v3211_v27  ;;  %1424 = vmatprep.subr.bf16.mxu0 %v3212_v28  ;;  %v3290_v14 = vld [vmem:[#allocation5 + $0x360] ss:$8 sps:$4 sm:$0xff]   ;;  %v3307_v15 = vld [vmem:[#allocation5 + $0x354] ss:$8 sps:$4 sm:$0xff]   ;;  %v3287_v18 = vld [vmem:[#allocation5 + $0x250] ss:$8 sps:$4 sm:$0xff]  }
  0x96   : > { %1537 = vmatprep.subr.bf16.mxu1 %v3214_v29  ;;  %v3286_v17 = vld [vmem:[%s3863_s20 + $0x40] ss:$28 sps:$4 sm:$0xff]   ;;  %v3295_v19 = vld [vmem:[#allocation5 + $0x244] ss:$8 sps:$4 sm:$0xff]   ;;  %v3305_v22 = vld [vmem:[#allocation5 + $0x350] ss:$8 sps:$4 sm:$0xff]  }
  0x97   : > { %v3298_v21 = vld [vmem:[%s3863_s20 + $0x7c] ss:$28 sps:$4 sm:$0xff]   ;;  %v3322_v23 = vld [vmem:[#allocation5 + $0x344] ss:$8 sps:$4 sm:$0xff]   ;;  %v3293_v24 = vld [vmem:[#allocation5 + $0x240] ss:$8 sps:$4 sm:$0xff]  }
  0x98   : > { %1425 = vmatpush1.bf16.msra.mxu0 %v3216_v30  ;;  %v3300_v25 = vld [vmem:[%s3863_s20 + $0x70] ss:$28 sps:$4 sm:$0xff]   ;;  %v3304_v26 = vld [vmem:[#allocation5 + $0x234] ss:$8 sps:$4 sm:$0xff]   ;;  %v3320_v28 = vld [vmem:[#allocation5 + $0x340] ss:$8 sps:$4 sm:$0xff]  }
  0x99   : > { %1538 = vmatpush1.bf16.msra.mxu1 %v3217_v31  ;;  %1426 = vmatprep.subr.bf16.mxu0 %v3218_v32  ;;  %v3301_v27 = vld [vmem:[%s3863_s20 + $0x78] ss:$28 sps:$4 sm:$0xff]   ;;  %v3310_v30 = vld [vmem:[#allocation5 + $0x224] ss:$8 sps:$4 sm:$0xff]   ;;  %s2701_s26 = sshll.u32 %s3859_s18, 7  ;;  %s2910_s1 = sshll.u32 %s3737_s9, 11 }
  0x9a   : > { %1539 = vmatprep.subr.bf16.mxu1 %v3220_v33  ;;  %v3302_v29 = vld [vmem:[#allocation5 + $0x230] ss:$8 sps:$4 sm:$0xff]   ;;  %v3311_v31 = vld [vmem:[%s3863_s20 + $0xac] ss:$28 sps:$4 sm:$0xff]   ;;  %v3337_v33 = vld [vmem:[#allocation5 + $0x334] ss:$8 sps:$4 sm:$0xff]   ;;  %s4248_s9 = scalar_lea.hbm %s4306_s8, %s2910_s1 }
  0x9b   : > { %v3313_v32 = vld [vmem:[%s3863_s20 + $0xb4] ss:$28 sps:$4 sm:$0xff]   ;;  %v3331_v49 = vld [vmem:[%s3863_s20 + $0xe8] ss:$28 sps:$4 sm:$0xff]   ;;  %s4171_s24 = scalar_lea.vmem [#allocation11], %s2701_s26  ;;  %s2562_s22 = scalar_lea.sflag [#allocation4], %s3859_s18 }
  0x9c   : > { %1427 = vmatpush2.bf16.msra.mxu0 %v3222_v34  ;;  %v3335_v34 = vld [vmem:[#allocation5 + $0x330] ss:$8 sps:$4 sm:$0xff]   ;;  %s2575_s2 = sshll.u32 %s4171_s24, 4  ;;  %p4336_p0 = scmp.ne.s32.totalorder %s4320_s17, 0  ;;  %s4250_s2 = int_to_ptr.vmem [resolvable:$true] %s2575_s2 }
  0x9d   : > { %1540 = vmatpush2.bf16.msra.mxu1 %v3223_v35  ;;  %1428 = vmatprep.subr.bf16.mxu0 %v3224_v36  ;;  %v3308_v35 = vld [vmem:[#allocation5 + $0x220] ss:$8 sps:$4 sm:$0xff]   ;;  %v3352_v36 = vld [vmem:[#allocation5 + $0x324] ss:$8 sps:$4 sm:$0xff]   ;;  %v3332_v51 = vld [vmem:[#allocation5 + $0x2f0] ss:$8 sps:$4 sm:$0xff]  }
  0x9e   : > { %1541 = vmatprep.subr.bf16.mxu1 %v3226_v37  ;;  %v3319_v37 = vld [vmem:[#allocation5 + $0x214] ss:$8 sps:$4 sm:$0xff]   ;;  %s3668_s11 = smov [#allocation11]  }
  0x9f   : > { %s3586_s13 = sshll.u32 %s3668_s11, 4  ;;  %s3587_s13 = int_to_ptr.vmem [resolvable:$false] %s3586_s13 }
  0xa0   : > { %1429 = vmatpush2.bf16.msra.mxu0 %v3228_v38  ;;  %v3315_v38 = vld [vmem:[%s3863_s20 + $0xa8] ss:$28 sps:$4 sm:$0xff]   ;;  %s3588_s14 = scalar_lea.vmem %s3587_s13, 4096  ;;  %p3589_p7 = scmp.lt.s32.totalorder %s4250_s2, %s3587_s13 }
  0xa1   : > { %1542 = vmatpush2.bf16.msra.mxu1 %v3229_v39  ;;  %1430 = vmatprep.subr.bf16.mxu0 %v3230_v40  ;;  %v3316_v39 = vld [vmem:[%s3863_s20 + $0xb0] ss:$28 sps:$4 sm:$0xff]  }
  0xa2   : > { %1543 = vmatprep.subr.bf16.mxu1 %v3232_v41  ;;  %v3317_v40 = vld [vmem:[#allocation5 + $0x210] ss:$8 sps:$4 sm:$0xff]   ;;  %v3325_v41 = vld [vmem:[#allocation5 + $0x204] ss:$8 sps:$4 sm:$0xff]  }
  0xa4   : > { %1431 = vmatpush2.bf16.msra.mxu0 %v3234_v42  ;;  %v3326_v42 = vld [vmem:[%s3863_s20 + $0xe4] ss:$28 sps:$4 sm:$0xff]  }
  0xa5   : > { %1544 = vmatpush2.bf16.msra.mxu1 %v3235_v43  ;;  %1432 = vmatprep.subr.bf16.mxu0 %v3236_v44  ;;  %v3328_v43 = vld [vmem:[%s3863_s20 + $0xec] ss:$28 sps:$4 sm:$0xff]  }
  0xa6   : > { %1545 = vmatprep.subr.bf16.mxu1 %v3238_v45  ;;  %v3350_v44 = vld [vmem:[#allocation5 + $0x320] ss:$8 sps:$4 sm:$0xff]   ;;  %v3367_v45 = vld [vmem:[#allocation5 + $0x314] ss:$8 sps:$4 sm:$0xff]  }
  0xa8   : > { %1433 = vmatpush2.bf16.msra.mxu0 %v3240_v46  ;;  %v3323_v46 = vld [vmem:[#allocation5 + $0x200] ss:$8 sps:$4 sm:$0xff]  }
  0xa9   : > { %1546 = vmatpush2.bf16.msra.mxu1 %v3241_v47  ;;  %1434 = vmatprep.subr.bf16.mxu0 %v3242_v48  ;;  %v3330_v47 = vld [vmem:[%s3863_s20 + $0xe0] ss:$28 sps:$4 sm:$0xff]  }
  0xaa   : > { %1547 = vmatprep.subr.bf16.mxu1 %v3244_v50  ;;  %v3334_v48 = vld [vmem:[#allocation5 + $0x2f4] ss:$8 sps:$4 sm:$0xff]   ;;  %v3365_v50 = vld [vmem:[#allocation5 + $0x310] ss:$8 sps:$4 sm:$0xff]  }
  0xac   : > { %1435 = vmatpush2.bf16.msra.mxu0 %v3246_v52  ;;  %v3340_v52 = vld [vmem:[#allocation5 + $0x2e4] ss:$8 sps:$4 sm:$0xff]  }
  0xad   : > { %1548 = vmatpush2.bf16.msra.mxu1 %v3247_v53  ;;  %1436 = vmatprep.subr.bf16.mxu0 %v3248_v54  ;;  %v3341_v53 = vld [vmem:[%s3863_s20 + $0x11c] ss:$28 sps:$4 sm:$0xff]   ;;  %v3343_v54 = vld [vmem:[%s3863_s20 + $0x124] ss:$28 sps:$4 sm:$0xff]  }
  0xae   : > { %1549 = vmatprep.subr.bf16.mxu1 %v3250_v55  ;;  %v3382_v55 = vld [vmem:[#allocation5 + $0x304] ss:$8 sps:$4 sm:$0xff]  }
  0xb0   : > { %1437 = vmatpush2.bf16.msra.mxu0 %v3252_v56  ;;  %v3380_v56 = vld [vmem:[#allocation5 + $0x300] ss:$8 sps:$4 sm:$0xff]  }
  0xb1   : > { %1550 = vmatpush2.bf16.msra.mxu1 %v3253_v57  ;;  %1438 = vmatprep.subr.bf16.mxu0 %v3254_v58  ;;  %v3338_v57 = vld [vmem:[#allocation5 + $0x2e0] ss:$8 sps:$4 sm:$0xff]   ;;  %v3345_v58 = vld [vmem:[%s3863_s20 + $0x118] ss:$28 sps:$4 sm:$0xff]  }
  0xb2   : > { %1551 = vmatprep.subr.bf16.mxu1 %v3256_v59  ;;  %v3346_v59 = vld [vmem:[%s3863_s20 + $0x120] ss:$28 sps:$4 sm:$0xff]  }
  0xb4   : > { %1439 = vmatpush2.bf16.msra.mxu0 %v3258_v60  ;;  %v3349_v60 = vld [vmem:[#allocation5 + $0x2d4] ss:$8 sps:$4 sm:$0xff]  }
  0xb5   : > { %1552 = vmatpush2.bf16.msra.mxu1 %v3259_v61  ;;  %1440 = vmatprep.subr.bf16.mxu0 %v3260_v62  ;;  %v3347_v61 = vld [vmem:[#allocation5 + $0x2d0] ss:$8 sps:$4 sm:$0xff]   ;;  %v3355_v62 = vld [vmem:[#allocation5 + $0x2c4] ss:$8 sps:$4 sm:$0xff]  }
  0xb6   : > { %1553 = vmatprep.subr.bf16.mxu1 %v3262_v63  ;;  %v3356_v63 = vld [vmem:[%s3863_s20 + $0x154] ss:$28 sps:$4 sm:$0xff]  }
  0xb8   : > { %1441 = vmatpush2.bf16.msra.mxu0 %v3264_v0  ;;  %v3358_v0 = vld [vmem:[%s3863_s20 + $0x15c] ss:$28 sps:$4 sm:$0xff]  }
  0xb9   : > { %1554 = vmatpush2.bf16.msra.mxu1 %v3265_v1  ;;  %1636 = vmatprep.subr.bf16.mxu0 %v3274_v2  ;;  %v3353_v1 = vld [vmem:[#allocation5 + $0x2c0] ss:$8 sps:$4 sm:$0xff]   ;;  %v3360_v2 = vld [vmem:[%s3863_s20 + $0x150] ss:$28 sps:$4 sm:$0xff]  }
  0xba   : > { %1749 = vmatprep.subr.bf16.mxu1 %v3277_v3  ;;  %v3364_v3 = vld [vmem:[#allocation5 + $0x2b4] ss:$8 sps:$4 sm:$0xff]  }
  0xbb   : > { %1443 = vmatmul.mubr.bf16.vlgmr.msra.gmra.mxu0 %v3266_v4  ;;  %v3361_v4 = vld [vmem:[%s3863_s20 + $0x158] ss:$28 sps:$4 sm:$0xff]  }
  0xbc   : > { %1556 = vmatmul.mubr.bf16.vlgmr.msra.gmra.mxu1 %v3269_v5  ;;  %1637 = vmatpush1.bf16.msra.mxu0 %v3272_v6  ;;  %v3362_v5 = vld [vmem:[#allocation5 + $0x2b0] ss:$8 sps:$4 sm:$0xff]   ;;  %v3371_v6 = vld [vmem:[%s3863_s20 + $0x18c] ss:$28 sps:$4 sm:$0xff]  }
  0xbd   : > { %1750 = vmatpush1.bf16.msra.mxu1 %v3275_v7  ;;  %1638 = vmatprep.subr.bf16.mxu0 %v3280_v8  ;;  %v3370_v7 = vld [vmem:[#allocation5 + $0x2a4] ss:$8 sps:$4 sm:$0xff]   ;;  %v3373_v8 = vld [vmem:[%s3863_s20 + $0x194] ss:$28 sps:$4 sm:$0xff]  }
  0xbe   : > { %1452 = vmatprep.mubr.bf16.mxu0 %v3281_v9  ;;  %1565 = vmatprep.mubr.bf16.mxu1 %v3283_v10  ;;  %v3368_v9 = vld [vmem:[#allocation5 + $0x2a0] ss:$8 sps:$4 sm:$0xff]   ;;  %v3379_v10 = vld [vmem:[#allocation5 + $0x294] ss:$8 sps:$4 sm:$0xff]  }
  0xbf   : > { %1751 = vmatprep.subr.bf16.mxu1 %v3292_v11  ;;  %v3375_v11 = vld [vmem:[%s3863_s20 + $0x188] ss:$28 sps:$4 sm:$0xff]  }
  0xc0   : > { %1639 = vmatpush1.bf16.msra.mxu0 %v3278_v12  ;;  %v3376_v12 = vld [vmem:[%s3863_s20 + $0x190] ss:$28 sps:$4 sm:$0xff]  }
  0xc1   : > { %1752 = vmatpush1.bf16.msra.mxu1 %v3290_v14  ;;  %1640 = vmatprep.subr.bf16.mxu0 %v3289_v13  ;;  %v3377_v13 = vld [vmem:[#allocation5 + $0x290] ss:$8 sps:$4 sm:$0xff]  }
  0xc2   : > { %1753 = vmatprep.subr.bf16.mxu1 %v3307_v15  ;;  %v3388_v14 = vld [vmem:[%s3863_s20 + $0x14] ss:$28 sps:$4 sm:$0xff]   ;;  %v3385_v15 = vld [vmem:[#allocation5 + $0x284] ss:$8 sps:$4 sm:$0xff]  }
  0xc3   : > { %1453 = vmatmul.mubr.bf16.gmra.mxu0 %v3285_v16  ;;  %v3383_v16 = vld [vmem:[#allocation5 + $0x280] ss:$8 sps:$4 sm:$0xff]  }
  0xc4   : > { %1566 = vmatmul.mubr.bf16.gmra.mxu1 %v3286_v17  ;;  %1641 = vmatpush1.bf16.msra.mxu0 %v3287_v18  ;;  %v3386_v17 = vld [vmem:[%s3863_s20 + $0x10] ss:$28 sps:$4 sm:$0xff]   ;;  %v3667_v18 = vmov 0  }
  0xc5   : > { %1462 = vmatprep.mubr.bf16.mxu0 %v3296_v20  ;;  %1642 = vmatprep.subr.bf16.mxu0 %v3295_v19  ;;  %v3389_v19 = vld [vmem:[%s3863_s20 + $0x18] ss:$28 sps:$4 sm:$0xff]   ;;  %v3390_v20 = vld [vmem:[%s3863_s20 + $0x4c] ss:$28 sps:$4 sm:$0xff]  }
  0xc6   : > { %1575 = vmatprep.mubr.bf16.mxu1 %v3298_v21  ;;  %1754 = vmatpush1.bf16.msra.mxu1 %v3305_v22  ;;  %v3392_v21 = vld [vmem:[%s3863_s20 + $0x48] ss:$28 sps:$4 sm:$0xff]   ;;  %v3393_v22 = vld [vmem:[%s3863_s20 + $0x50] ss:$28 sps:$4 sm:$0xff]  }
  0xc7   : > { %1755 = vmatprep.subr.bf16.mxu1 %v3322_v23  ;;  %v3394_v23 = vld [vmem:[%s3863_s20 + $0x84] ss:$28 sps:$4 sm:$0xff]  }
  0xc8   : > { %1643 = vmatpush1.bf16.msra.mxu0 %v3293_v24  ;;  %v3396_v24 = vld [vmem:[%s3863_s20 + $0x80] ss:$28 sps:$4 sm:$0xff]  }
  0xc9   : > { %1644 = vmatprep.subr.bf16.mxu0 %v3304_v26  ;;  %v3398_v26 = vld [vmem:[%s3863_s20 + $0xbc] ss:$28 sps:$4 sm:$0xff]  }
  0xca   : > { %1756 = vmatpush1.bf16.msra.mxu1 %v3320_v28  ;;  %v3419_v28 = vld [vmem:[#allocation7 + $0x38] sm:$0xff]  }
  0xcb   : > { %1463 = vmatmul.mubr.bf16.gmra.mxu0 %v3300_v25  ;;  %1757 = vmatprep.subr.bf16.mxu1 %v3337_v33  ;;  %v3397_v25 = vld [vmem:[%s3863_s20 + $0x88] ss:$28 sps:$4 sm:$0xff]   ;;  %v3421_v33 = vld [vmem:[#allocation7 + $0x30] sm:$0xff]  }
  0xcc   : > { %1576 = vmatmul.mubr.bf16.gmra.mxu1 %v3301_v27  ;;  %1645 = vmatpush1.bf16.msra.mxu0 %v3302_v29  ;;  %v3418_v27 = vld [vmem:[#allocation7 + $0x78] sm:$0xff]  }
  0xcd   : > { %1472 = vmatprep.mubr.bf16.mxu0 %v3311_v31  ;;  %1646 = vmatprep.subr.bf16.mxu0 %v3310_v30  ;;  %v3400_v29 = vld [vmem:[%s3863_s20 + $0xb8] ss:$28 sps:$4 sm:$0xff]   ;;  %v3401_v30 = vld [vmem:[%s3863_s20 + $0xc0] ss:$28 sps:$4 sm:$0xff]  }
  0xce   : > { %1585 = vmatprep.mubr.bf16.mxu1 %v3313_v32  ;;  %1758 = vmatpush1.bf16.msra.mxu1 %v3335_v34  ;;  %v3402_v31 = vld [vmem:[%s3863_s20 + $0xf4] ss:$28 sps:$4 sm:$0xff]  }
  0xcf   : > { %1759 = vmatprep.subr.bf16.mxu1 %v3352_v36  ;;  %v3420_v32 = vld [vmem:[#allocation7 + $0x70] sm:$0xff]   ;;  %v3406_v36 = vld [vmem:[%s3863_s20 + $0x12c] ss:$28 sps:$4 sm:$0xff]  }
  0xd0   : > { %1647 = vmatpush1.bf16.msra.mxu0 %v3308_v35  ;;  %v3404_v34 = vld [vmem:[%s3863_s20 + $0xf0] ss:$28 sps:$4 sm:$0xff]   ;;  %v3405_v35 = vld [vmem:[%s3863_s20 + $0xf8] ss:$28 sps:$4 sm:$0xff]  }
  0xd1   : > { %1648 = vmatprep.subr.bf16.mxu0 %v3319_v37  ;;  %v3422_v37 = vld [vmem:[#allocation7 + $0x68] sm:$0xff]  }
  0xd2   : > { %1760 = vmatpush1.bf16.msra.mxu1 %v3350_v44  ;;  %v3412_v44 = vld [vmem:[%s3863_s20 + $0x160] ss:$28 sps:$4 sm:$0xff]  }
  0xd3   : > { %1473 = vmatmul.mubr.bf16.gmra.mxu0 %v3315_v38  ;;  %1761 = vmatprep.subr.bf16.mxu1 %v3367_v45  ;;  %v3423_v38 = vld [vmem:[#allocation7 + $0x28] sm:$0xff]  }
  0xd4   : > { %1586 = vmatmul.mubr.bf16.gmra.mxu1 %v3316_v39  ;;  %1649 = vmatpush1.bf16.msra.mxu0 %v3317_v40  ;;  %v3408_v39 = vld [vmem:[%s3863_s20 + $0x128] ss:$28 sps:$4 sm:$0xff]   ;;  %v3409_v40 = vld [vmem:[%s3863_s20 + $0x130] ss:$28 sps:$4 sm:$0xff]  }
  0xd5   : > { %1482 = vmatprep.mubr.bf16.mxu0 %v3326_v42  ;;  %1650 = vmatprep.subr.bf16.mxu0 %v3325_v41  ;;  %v3410_v41 = vld [vmem:[%s3863_s20 + $0x164] ss:$28 sps:$4 sm:$0xff]  }
  0xd6   : > { %1595 = vmatprep.mubr.bf16.mxu1 %v3328_v43  ;;  %1762 = vmatpush1.bf16.msra.mxu1 %v3365_v50  ;;  %v3424_v42 = vld [vmem:[#allocation7 + $0x60] sm:$0xff]  }
  0xd7   : > { %1763 = vmatprep.subr.bf16.mxu1 %v3382_v55  ;;  %v3425_v43 = vld [vmem:[#allocation7 + $0x20] sm:$0xff]  }
  0xd8   : > { %1651 = vmatpush1.bf16.msra.mxu0 %v3323_v46  ;;  %v3413_v45 = vld [vmem:[%s3863_s20 + $0x168] ss:$28 sps:$4 sm:$0xff]   ;;  %v3414_v46 = vld [vmem:[%s3863_s20 + $0x19c] ss:$28 sps:$4 sm:$0xff]  }
  0xd9   : > { %1652 = vmatprep.subr.bf16.mxu0 %v3334_v48  ;;  %v3427_v48 = vld [vmem:[#allocation7 + $0x18] sm:$0xff]   ;;  %v3432_v55 = vld [vmem:[#allocation7 + $0x40] sm:$0xff]  }
  0xda   : > { %1764 = vmatpush1.bf16.msra.mxu1 %v3380_v56  ;;  %v3417_v50 = vld [vmem:[%s3863_s20 + $0x1a0] ss:$28 sps:$4 sm:$0xff]  }
  0xdb   : > { %1483 = vmatmul.mubr.bf16.gmra.mxu0 %v3330_v47  ;;  %v3426_v47 = vld [vmem:[#allocation7 + $0x58] sm:$0xff]   ;;  %v3433_v56 = vld [vmem:[#allocation7] sm:$0xff]  }
  0xdc   : > { %1596 = vmatmul.mubr.bf16.gmra.mxu1 %v3331_v49  ;;  %1653 = vmatpush2.bf16.msra.mxu0 %v3332_v51  ;;  %v3416_v49 = vld [vmem:[%s3863_s20 + $0x198] ss:$28 sps:$4 sm:$0xff]   ;;  %s3582_s20 = scalar_lea.vmem %s4250_s2, 2048 }
  0xdd   : > { %1492 = vmatprep.mubr.bf16.mxu0 %v3341_v53  ;;  %1654 = vmatprep.subr.bf16.mxu0 %v3340_v52  ;;  %v3428_v51 = vld [vmem:[#allocation7 + $0x50] sm:$0xff]   ;;  %v3430_v53 = vld [vmem:[#allocation7 + $0x48] sm:$0xff]   ;;  %p3583_p12 = scmp.ne.s32.totalorder %s4250_s2, %s3582_s20  ;;  %p3590_p9 = scmp.lt.s32.totalorder %s3588_s14, %s3582_s20 }
  0xde   : > { %1605 = vmatprep.mubr.bf16.mxu1 %v3343_v54  ;;  %v3429_v52 = vld [vmem:[#allocation7 + $0x10] sm:$0xff]   ;;  %v3431_v54 = vld [vmem:[#allocation7 + $0x8] sm:$0xff]  }
  0xdf   : > { %p3584_p2 = pnand %p3583_p12, %p4336_p0  ;;  %p3591_p1 = por %p3590_p9, %p3589_p7 }
  0xe0   : > { %1655 = vmatpush2.bf16.msra.mxu0 %v3338_v57 }
  0xe1   : > { %1656 = vmatprep.subr.bf16.mxu0 %v3349_v60  ;;  %p3585_p3 = pneg %p3584_p2 }
  0xe3   : > { %1493 = vmatmul.mubr.bf16.gmra.mxu0 %v3345_v58  ;;  %p3592_p10 = pnand %p3591_p1, %p3585_p3 }
  0xe4   : > { %1606 = vmatmul.mubr.bf16.gmra.mxu1 %v3346_v59  ;;  %1657 = vmatpush2.bf16.msra.mxu0 %v3347_v61 }
  0xe5   : > { %1502 = vmatprep.mubr.bf16.mxu0 %v3356_v63  ;;  %1658 = vmatprep.subr.bf16.mxu0 %v3355_v62 }
  0xe6   : > { %1615 = vmatprep.mubr.bf16.mxu1 %v3358_v0 }
  0xe8   : > { %1659 = vmatpush2.bf16.msra.mxu0 %v3353_v1 }
  0xe9   : > { %1660 = vmatprep.subr.bf16.mxu0 %v3364_v3 }
  0xeb   : > { %1503 = vmatmul.mubr.bf16.gmra.mxu0 %v3360_v2 }
  0xec   : > { %1616 = vmatmul.mubr.bf16.gmra.mxu1 %v3361_v4  ;;  %1661 = vmatpush2.bf16.msra.mxu0 %v3362_v5  ;;  %v3434_v5 = vld [vmem:[#allocation8 + $0x38] sm:$0xff]  }
  0xed   : > { %1512 = vmatprep.mubr.bf16.mxu0 %v3371_v6  ;;  %1662 = vmatprep.subr.bf16.mxu0 %v3370_v7  ;;  %v3435_v6 = vld [vmem:[#allocation8 + $0x30] sm:$0xff]  }
  0xee   : > { %1625 = vmatprep.mubr.bf16.mxu1 %v3373_v8  ;;  %3007 = vmatprep.subr.bf16.mxu1 %v3434_v5 }
  0xf0   : > { %1663 = vmatpush2.bf16.msra.mxu0 %v3368_v9 }
  0xf1   : > { %1664 = vmatprep.subr.bf16.mxu0 %v3379_v10 }
  0xf3   : > { %1513 = vmatmul.mubr.bf16.gmra.mxu0 %v3375_v11 }
  0xf4   : > { %1626 = vmatmul.mubr.bf16.gmra.mxu1 %v3376_v12  ;;  %1665 = vmatpush2.bf16.msra.mxu0 %v3377_v13  ;;  %v3436_v13 = vld [vmem:[#allocation8 + $0x28] sm:$0xff]  }
  0xf5   : > { %1668 = vmatprep.mubr.bf16.mxu0 %v3388_v14  ;;  %1666 = vmatprep.subr.bf16.mxu0 %v3385_v15 }
  0xf6   : > { %1781 = vmatprep.mubr.bf16.mxu1 %v3667_v18 }
  0xf8   : > { %1667 = vmatpush2.bf16.msra.mxu0 %v3383_v16 }
  0xf9   : > { %2911 = vmatprep.subr.bf16.mxu0 %v3418_v27 }
  0xfb   : > { %1669 = vmatmul.mubr.bf16.vlgmr.msra.gmra.mxu0 %v3386_v17 }
  0xfc   : > { %1782 = vmatmul.mubr.bf16.vlgmr.msra.gmra.mxu1 %v3389_v19  ;;  %1678 = vmatprep.mubr.bf16.mxu0 %v3390_v20 }
  0xfd   : > { %1791 = vmatprep.mubr.bf16.mxu1 %v3667_v18  ;;  %2912 = vmatpush3.bf16.msra.mxu0 %v3419_v28 }
  0xfe   : > { %2913 = vmatprep.subr.bf16.mxu0 %v3420_v32  ;;  %3008 = vmatpush3.bf16.msra.mxu1 %v3434_v5 }
  0xff   : > { %3009 = vmatprep.subr.bf16.mxu1 %v3435_v6 }
 0x101   : > { %2914 = vmatpush3.bf16.msra.mxu0 %v3421_v33 }
 0x102   : > { %2915 = vmatprep.subr.bf16.mxu0 %v3422_v37  ;;  %3010 = vmatpush3.bf16.msra.mxu1 %v3435_v6 }
 0x103   : > { %1679 = vmatmul.mubr.bf16.gmra.mxu0 %v3392_v21  ;;  %3011 = vmatprep.subr.bf16.mxu1 %v3436_v13 }
 0x104   : > { %1792 = vmatmul.mubr.bf16.gmra.mxu1 %v3393_v22  ;;  %1688 = vmatprep.mubr.bf16.mxu0 %v3394_v23 }
 0x105   : > { %1801 = vmatprep.mubr.bf16.mxu1 %v3667_v18  ;;  %2916 = vmatpush3.bf16.msra.mxu0 %v3423_v38 }
 0x106   : > { %2917 = vmatprep.subr.bf16.mxu0 %v3424_v42  ;;  %3012 = vmatpush3.bf16.msra.mxu1 %v3436_v13 }
 0x109   : > { %2918 = vmatpush3.bf16.msra.mxu0 %v3425_v43 }
 0x10a   : > { %2919 = vmatprep.subr.bf16.mxu0 %v3426_v47 }
 0x10b   : > { %1689 = vmatmul.mubr.bf16.gmra.mxu0 %v3396_v24 }
 0x10c   : > { %1802 = vmatmul.mubr.bf16.gmra.mxu1 %v3397_v25  ;;  %1698 = vmatprep.mubr.bf16.mxu0 %v3398_v26 }
 0x10d   : > { %1811 = vmatprep.mubr.bf16.mxu1 %v3667_v18  ;;  %2920 = vmatpush3.bf16.msra.mxu0 %v3427_v48 }
 0x10e   : > { %2921 = vmatprep.subr.bf16.mxu0 %v3428_v51 }
 0x111   : > { %2922 = vmatpush3.bf16.msra.mxu0 %v3429_v52 }
 0x112   : > { %2923 = vmatprep.subr.bf16.mxu0 %v3430_v53 }
 0x113   : > { %1699 = vmatmul.mubr.bf16.gmra.mxu0 %v3400_v29 }
 0x114   : > { %1812 = vmatmul.mubr.bf16.gmra.mxu1 %v3401_v30  ;;  %1708 = vmatprep.mubr.bf16.mxu0 %v3402_v31 }
 0x115   : > { %1821 = vmatprep.mubr.bf16.mxu1 %v3667_v18  ;;  %2924 = vmatpush3.bf16.msra.mxu0 %v3431_v54 }
 0x116   : > { %2925 = vmatprep.subr.bf16.mxu0 %v3432_v55 }
 0x119   : > { %2926 = vmatpush3.bf16.msra.mxu0 %v3433_v56 }
 0x11b   : > { %1709 = vmatmul.mubr.bf16.gmra.mxu0 %v3404_v34 }
 0x11c   : > { %1822 = vmatmul.mubr.bf16.gmra.mxu1 %v3405_v35  ;;  %1718 = vmatprep.mubr.bf16.mxu0 %v3406_v36 }
 0x11d   : > { %1831 = vmatprep.mubr.bf16.mxu1 %v3667_v18 }
 0x123   : > { %1719 = vmatmul.mubr.bf16.gmra.mxu0 %v3408_v39 }
 0x124   : > { %1832 = vmatmul.mubr.bf16.gmra.mxu1 %v3409_v40  ;;  %1728 = vmatprep.mubr.bf16.mxu0 %v3410_v41 }
 0x125   : > { %1841 = vmatprep.mubr.bf16.mxu1 %v3667_v18 }
 0x12b   : > { %1729 = vmatmul.mubr.bf16.gmra.mxu0 %v3412_v44 }
 0x12c   : > { %1842 = vmatmul.mubr.bf16.gmra.mxu1 %v3413_v45  ;;  %1738 = vmatprep.mubr.bf16.mxu0 %v3414_v46 }
 0x12d   : > { %1851 = vmatprep.mubr.bf16.mxu1 %v3667_v18 }
 0x133   : > { %1739 = vmatmul.mubr.bf16.gmra.mxu0 %v3416_v49 }
 0x134   : > { %1852 = vmatmul.mubr.bf16.gmra.mxu1 %v3417_v50 }
 0x17b   : > { %v1444_v57 = vpop.f32.mrf.mxu0 }
 0x17c   : > { %v1557_v58 = vpop.f32.mrf.mxu1 }
 0x17d   : > { %v3941_v59 = vadd.f32 %v1557_v58, %v1444_v57  ;;  %v1446_v60 = vpop.f32.mrf.mxu0 }
 0x17e   : > { %v1559_v61 = vpop.f32.mrf.mxu1 }
 0x17f   : > { %v3943_v62 = vadd.f32 %v1559_v61, %v1446_v60  ;;  %v3945_v63 = vpop.f32.mrf.mxu0 }
 0x180   : > { %v3947_v0 = vpop.f32.mrf.mxu1 }
 0x181   : > { %v3949_v1 = vpop.f32.mrf.mxu0 }
 0x182   : > { %v3951_v2 = vpop.f32.mrf.mxu1 }
 0x183   : > { %v1454_v3 = vpop.f32.mrf.mxu0 }
 0x184   : > { %v1567_v4 = vpop.f32.mrf.mxu1 }
 0x185   : > { %v3953_v7 = vadd.f32 %v1567_v4, %v1454_v3  ;;  %v1456_v8 = vpop.f32.mrf.mxu0 }
 0x186   : > { %v1569_v9 = vpop.f32.mrf.mxu1 }
 0x187   : > { %v3955_v10 = vadd.f32 %v1569_v9, %v1456_v8  ;;  %v3957_v11 = vpop.f32.mrf.mxu0 }
 0x188   : > { %v3959_v12 = vpop.f32.mrf.mxu1 }
 0x189   : > { %v3961_v14 = vpop.f32.mrf.mxu0 }
 0x18a   : > { %v3963_v15 = vpop.f32.mrf.mxu1 }
 0x18b   : > { %v1464_v16 = vpop.f32.mrf.mxu0 }
 0x18c   : > { %v1577_v17 = vpop.f32.mrf.mxu1 }
 0x18d   : > { %v3965_v18 = vadd.f32 %v1577_v17, %v1464_v16  ;;  %v1466_v19 = vpop.f32.mrf.mxu0 }
 0x18e   : > { %v1579_v20 = vpop.f32.mrf.mxu1 }
 0x18f   : > { %v3967_v21 = vadd.f32 %v1579_v20, %v1466_v19  ;;  %v3969_v22 = vpop.f32.mrf.mxu0 }
 0x190   : > { %v3971_v23 = vpop.f32.mrf.mxu1 }
 0x191   : > { %v3973_v24 = vpop.f32.mrf.mxu0 }
 0x192   : > { %v3975_v25 = vpop.f32.mrf.mxu1 }
 0x193   : > { %v1474_v26 = vpop.f32.mrf.mxu0 }
 0x194   : > { %v1587_v27 = vpop.f32.mrf.mxu1 }
 0x195   : > { %v3977_v28 = vadd.f32 %v1587_v27, %v1474_v26  ;;  %v1476_v29 = vpop.f32.mrf.mxu0 }
 0x196   : > { %v1589_v30 = vpop.f32.mrf.mxu1 }
 0x197   : > { %v3979_v31 = vadd.f32 %v1589_v30, %v1476_v29  ;;  %v3981_v32 = vpop.f32.mrf.mxu0 }
 0x198   : > { %v3983_v33 = vpop.f32.mrf.mxu1 }
 0x199   : > { %v3985_v34 = vpop.f32.mrf.mxu0 }
 0x19a   : > { %v3987_v35 = vpop.f32.mrf.mxu1 }
 0x19b   : > { %v1484_v36 = vpop.f32.mrf.mxu0 }
 0x19c   : > { %v1597_v37 = vpop.f32.mrf.mxu1 }
 0x19d   : > { %v3989_v38 = vadd.f32 %v1597_v37, %v1484_v36  ;;  %v1486_v39 = vpop.f32.mrf.mxu0 }
 0x19e   : > { %v1599_v40 = vpop.f32.mrf.mxu1 }
 0x19f   : > { %v3991_v41 = vadd.f32 %v1599_v40, %v1486_v39  ;;  %v3993_v42 = vpop.f32.mrf.mxu0 }
 0x1a0   : > { %v3995_v43 = vpop.f32.mrf.mxu1 }
 0x1a1   : > { %v3997_v44 = vpop.f32.mrf.mxu0 }
 0x1a2   : > { %v3999_v45 = vpop.f32.mrf.mxu1 }
 0x1a3   : > { %v1494_v46 = vpop.f32.mrf.mxu0 }
 0x1a4   : > { %v1607_v47 = vpop.f32.mrf.mxu1 }
 0x1a5   : > { %v4001_v48 = vadd.f32 %v1607_v47, %v1494_v46  ;;  %v1496_v49 = vpop.f32.mrf.mxu0  ;;  %v1562_v47 = vadd.f32 %v3947_v0, %v3945_v63 }
 0x1a6   : > { %v1609_v50 = vpop.f32.mrf.mxu1 }
 0x1a7   : > { %v4003_v51 = vadd.f32 %v1609_v50, %v1496_v49  ;;  %v4005_v52 = vpop.f32.mrf.mxu0 }
 0x1a8   : > { %v4007_v53 = vpop.f32.mrf.mxu1 }
 0x1a9   : > { %v4009_v54 = vpop.f32.mrf.mxu0 }
 0x1aa   : > { %v4011_v55 = vpop.f32.mrf.mxu1 }
 0x1ab   : > { %v1504_v56 = vpop.f32.mrf.mxu0 }
 0x1ac   : > { %v1617_v57 = vpop.f32.mrf.mxu1 }
 0x1ad   : > { %v4013_v58 = vadd.f32 %v1617_v57, %v1504_v56  ;;  %v1506_v60 = vpop.f32.mrf.mxu0  ;;  %v1564_v57 = vadd.f32 %v3951_v2, %v3949_v1 }
 0x1ae   : > { %v1619_v61 = vpop.f32.mrf.mxu1 }
 0x1af   : > { %v4015_v3 = vadd.f32 %v1619_v61, %v1506_v60  ;;  %v4017_v4 = vpop.f32.mrf.mxu0 }
 0x1b0   : > { %v4019_v5 = vpop.f32.mrf.mxu1 }
 0x1b1   : > { %v4021_v6 = vpop.f32.mrf.mxu0 }
 0x1b2   : > { %v4023_v8 = vpop.f32.mrf.mxu1 }
 0x1b3   : > { %v1514_v9 = vpop.f32.mrf.mxu0 }
 0x1b4   : > { %v1627_v13 = vpop.f32.mrf.mxu1 }
 0x1b5   : > { %v4025_v16 = vadd.f32 %v1627_v13, %v1514_v9  ;;  %v1516_v17 = vpop.f32.mrf.mxu0 }
 0x1b6   : > { %v1629_v19 = vpop.f32.mrf.mxu1 }
 0x1b7   : > { %v4027_v20 = vadd.f32 %v1629_v19, %v1516_v17  ;;  %v4029_v26 = vpop.f32.mrf.mxu0 }
 0x1b8   : > { %v4031_v27 = vpop.f32.mrf.mxu1 }
 0x1b9   : > { %4328 = vst [vmem:[#allocation16_spill] sm:$0xff] %v4027_v20  ;;  %4329 = vst [vmem:[#allocation17_spill] sm:$0xff] %v4031_v27  ;;  %v4033_v29 = vpop.f32.mrf.mxu0 }
 0x1ba   : > { %4330 = vst [vmem:[#allocation18_spill] sm:$0xff] %v4033_v29  ;;  %v4035_v30 = vpop.f32.mrf.mxu1 }
 0x1bb   : > { %4331 = vst [vmem:[#allocation19_spill] sm:$0xff] %v4035_v30  ;;  %v1670_v36 = vpop.f32.mrf.mxu0 }
 0x1bc   : > { %v1783_v37 = vpop.f32.mrf.mxu1  ;;  %v1671_v39 = vadd.f32 %v1670_v36, %v3941_v59 }
 0x1bd   : > { %v1672_v40 = vpop.f32.mrf.mxu0 }
 0x1be   : > { %v1785_v46 = vpop.f32.mrf.mxu1  ;;  %v1673_v49 = vadd.f32 %v1672_v40, %v3943_v62  ;;  %v1784_v60 = vadd.f32 %v1783_v37, %v1671_v39  ;;  %v1572_v62 = vadd.f32 %v3959_v12, %v3957_v11 }
 0x1bf   : > { %v1674_v50 = vpop.f32.mrf.mxu0 }
 0x1c0   : > { %v1787_v56 = vpop.f32.mrf.mxu1  ;;  %v1675_v61 = vadd.f32 %v1674_v50, %v1562_v47  ;;  %v1786_v17 = vadd.f32 %v1785_v46, %v1673_v49  ;;  %v1862_v29 = vmax.f32 %v1784_v60, 0.0  ;;  %v1574_v49 = vadd.f32 %v3963_v15, %v3961_v14 }
 0x1c1   : > { %v1676_v9 = vpop.f32.mrf.mxu0  ;;  %v1582_v14 = vadd.f32 %v3971_v23, %v3969_v22 }
 0x1c2   : > { %v1789_v13 = vpop.f32.mrf.mxu1  ;;  %v1788_v19 = vadd.f32 %v1787_v56, %v1675_v61  ;;  %v1677_v30 = vadd.f32 %v1676_v9, %v1564_v57  ;;  %v1863_v1 = vmax.f32 %v1786_v17, 0.0 }
 0x1c3   : > { %v1680_v59 = vpop.f32.mrf.mxu0 }
 0x1c4   : > { %v1793_v36 = vpop.f32.mrf.mxu1  ;;  %v1864_v20 = vmax.f32 %v1788_v19, 0.0  ;;  %v1790_v27 = vadd.f32 %v1789_v13, %v1677_v30  ;;  %v1681_v63 = vadd.f32 %v1680_v59, %v3953_v7 }
 0x1c5   : > { %v1682_v0 = vpop.f32.mrf.mxu0 }
 0x1c6   : > { %v1795_v40 = vpop.f32.mrf.mxu1  ;;  %v1894_v2 = vpack.c.bf16 %v1864_v20, %v1862_v29  ;;  %v1865_v37 = vmax.f32 %v1790_v27, 0.0  ;;  %v1683_v39 = vadd.f32 %v1682_v0, %v3955_v10  ;;  %v1794_v56 = vadd.f32 %v1793_v36, %v1681_v63 }
 0x1c7   : > { %v1684_v46 = vpop.f32.mrf.mxu0  ;;  %v1584_v0 = vadd.f32 %v3975_v25, %v3973_v24  ;;  %v1592_v24 = vadd.f32 %v3983_v33, %v3981_v32 }
 0x1c8   : > { %v1797_v47 = vpop.f32.mrf.mxu1  ;;  %v1895_v50 = vpack.c.bf16 %v1865_v37, %v1863_v1  ;;  %v1685_v30 = vadd.f32 %v1684_v46, %v1572_v62  ;;  %v1796_v60 = vadd.f32 %v1795_v40, %v1683_v39  ;;  %v1866_v20 = vmax.f32 %v1794_v56, 0.0 }
 0x1c9   : > { %v1686_v57 = vpop.f32.mrf.mxu0 }
 0x1ca   : > { %v1799_v7 = vpop.f32.mrf.mxu1  ;;  %v1798_v61 = vadd.f32 %v1797_v47, %v1685_v30  ;;  %v1687_v11 = vadd.f32 %v1686_v57, %v1574_v49  ;;  %2077 = vmatprep.mubr.bf16.mxu0 %v1895_v50  ;;  %v1867_v17 = vmax.f32 %v1796_v60, 0.0 }
 0x1cb   : > { %v1690_v12 = vpop.f32.mrf.mxu0  ;;  %2078 = vmatmul.mubr.bf16.vlgmr.msra.gmra.mxu0 %v1894_v2 }
 0x1cc   : > { %v1803_v9 = vpop.f32.mrf.mxu1  ;;  %v1868_v27 = vmax.f32 %v1798_v61, 0.0  ;;  %v1800_v10 = vadd.f32 %v1799_v7, %v1687_v11  ;;  %v1691_v29 = vadd.f32 %v1690_v12, %v3965_v18 }
 0x1cd   : > { %v1692_v15 = vpop.f32.mrf.mxu0 }
 0x1ce   : > { %v1805_v13 = vpop.f32.mrf.mxu1  ;;  %v1896_v19 = vpack.c.bf16 %v1868_v27, %v1866_v20  ;;  %v1869_v59 = vmax.f32 %v1800_v10, 0.0  ;;  %v1693_v36 = vadd.f32 %v1692_v15, %v3967_v21  ;;  %v1804_v1 = vadd.f32 %v1803_v9, %v1691_v29 }
 0x1cf   : > { %v1694_v63 = vpop.f32.mrf.mxu0  ;;  %v1594_v9 = vadd.f32 %v3987_v35, %v3985_v34  ;;  %v1602_v34 = vadd.f32 %v3995_v43, %v3993_v42 }
 0x1d0   : > { %v1807_v62 = vpop.f32.mrf.mxu1  ;;  %v1897_v40 = vpack.c.bf16 %v1869_v59, %v1867_v17  ;;  %v1695_v2 = vadd.f32 %v1694_v63, %v1582_v14  ;;  %v1806_v39 = vadd.f32 %v1805_v13, %v1693_v36  ;;  %v1870_v49 = vmax.f32 %v1804_v1, 0.0 }
 0x1d1   : > { %v1696_v37 = vpop.f32.mrf.mxu0 }
 0x1d2   : > { %v1809_v18 = vpop.f32.mrf.mxu1  ;;  %v1808_v46 = vadd.f32 %v1807_v62, %v1695_v2  ;;  %v1697_v22 = vadd.f32 %v1696_v37, %v1584_v0  ;;  %2085 = vmatprep.mubr.bf16.mxu0 %v1897_v40  ;;  %v1871_v57 = vmax.f32 %v1806_v39, 0.0  ;;  %v1604_v37 = vadd.f32 %v3999_v45, %v3997_v44 }
 0x1d3   : > { %v1700_v23 = vpop.f32.mrf.mxu0  ;;  %2086 = vmatmul.mubr.bf16.gmra.mxu0 %v1896_v19  ;;  %v1612_v44 = vadd.f32 %v4007_v53, %v4005_v52 }
 0x1d4   : > { %v1813_v47 = vpop.f32.mrf.mxu1  ;;  %v1872_v50 = vmax.f32 %v1808_v46, 0.0  ;;  %v1810_v21 = vadd.f32 %v1809_v18, %v1697_v22  ;;  %v1701_v56 = vadd.f32 %v1700_v23, %v3977_v28 }
 0x1d5   : > { %v1702_v25 = vpop.f32.mrf.mxu0 }
 0x1d6   : > { %v1815_v30 = vpop.f32.mrf.mxu1  ;;  %v1898_v7 = vpack.c.bf16 %v1872_v50, %v1870_v49  ;;  %v1873_v60 = vmax.f32 %v1810_v21, 0.0  ;;  %v1703_v61 = vadd.f32 %v1702_v25, %v3979_v31  ;;  %v1814_v27 = vadd.f32 %v1813_v47, %v1701_v56 }
 0x1d7   : > { %v1704_v11 = vpop.f32.mrf.mxu0 }
 0x1d8   : > { %v1817_v12 = vpop.f32.mrf.mxu1  ;;  %v1899_v20 = vpack.c.bf16 %v1873_v60, %v1871_v57  ;;  %v1705_v10 = vadd.f32 %v1704_v11, %v1592_v24  ;;  %v1816_v14 = vadd.f32 %v1815_v30, %v1703_v61  ;;  %v1874_v17 = vmax.f32 %v1814_v27, 0.0 }
 0x1d9   : > { %v1706_v29 = vpop.f32.mrf.mxu0  ;;  %v1614_v11 = vadd.f32 %v4011_v55, %v4009_v54  ;;  %v1622_v54 = vadd.f32 %v4019_v5, %v4017_v4 }
 0x1da   : > { %v1819_v28 = vpop.f32.mrf.mxu1  ;;  %v1818_v15 = vadd.f32 %v1817_v12, %v1705_v10  ;;  %v1707_v32 = vadd.f32 %v1706_v29, %v1594_v9  ;;  %2093 = vmatprep.mubr.bf16.mxu0 %v1899_v20  ;;  %v1875_v63 = vmax.f32 %v1816_v14, 0.0 }
 0x1db   : > { %v1710_v33 = vpop.f32.mrf.mxu0  ;;  %2094 = vmatmul.mubr.bf16.gmra.mxu0 %v1898_v7 }
 0x1dc   : > { %v1823_v13 = vpop.f32.mrf.mxu1  ;;  %v1876_v19 = vmax.f32 %v1818_v15, 0.0  ;;  %v1820_v31 = vadd.f32 %v1819_v28, %v1707_v32  ;;  %v1711_v59 = vadd.f32 %v1710_v33, %v3989_v38 }
 0x1dd   : > { %v1712_v35 = vpop.f32.mrf.mxu0 }
 0x1de   : > { %v1825_v36 = vpop.f32.mrf.mxu1  ;;  %v1900_v62 = vpack.c.bf16 %v1876_v19, %v1874_v17  ;;  %v1877_v0 = vmax.f32 %v1820_v31, 0.0  ;;  %v1713_v40 = vadd.f32 %v1712_v35, %v3991_v41  ;;  %v1824_v39 = vadd.f32 %v1823_v13, %v1711_v59 }
 0x1df   : > { %v1714_v1 = vpop.f32.mrf.mxu0  ;;  %v1624_v35 = vadd.f32 %v4023_v8, %v4021_v6 }
 0x1e0   : > { %v1827_v2 = vpop.f32.mrf.mxu1  ;;  %v1901_v18 = vpack.c.bf16 %v1877_v0, %v1875_v63  ;;  %v1715_v46 = vadd.f32 %v1714_v1, %v1602_v34  ;;  %v1826_v23 = vadd.f32 %v1825_v36, %v1713_v40  ;;  %v1878_v50 = vmax.f32 %v1824_v39, 0.0 }
 0x1e1   : > { %v1716_v22 = vpop.f32.mrf.mxu0 }
 0x1e2   : > { %v1829_v38 = vpop.f32.mrf.mxu1  ;;  %v1828_v47 = vadd.f32 %v1827_v2, %v1715_v46  ;;  %v1717_v42 = vadd.f32 %v1716_v22, %v1604_v37  ;;  %2101 = vmatprep.mubr.bf16.mxu0 %v1901_v18  ;;  %v1879_v25 = vmax.f32 %v1826_v23, 0.0  ;;  %v4332_v46 = vld [vmem:[#allocation17_spill] sm:$0xff] }
 0x1e3   : > { %v1720_v43 = vpop.f32.mrf.mxu0  ;;  %2102 = vmatmul.mubr.bf16.gmra.mxu0 %v1900_v62  ;;  %v1632_v6 = vadd.f32 %v4332_v46, %v4029_v26 }
 0x1e4   : > { %v1833_v49 = vpop.f32.mrf.mxu1  ;;  %v1880_v21 = vmax.f32 %v1828_v47, 0.0  ;;  %v1830_v41 = vadd.f32 %v1829_v38, %v1717_v42  ;;  %v1721_v56 = vadd.f32 %v1720_v43, %v4001_v48  ;;  %v4333_v42 = vld [vmem:[#allocation16_spill] sm:$0xff] }
 0x1e5   : > { %v1722_v45 = vpop.f32.mrf.mxu0 }
 0x1e6   : > { %v1835_v24 = vpop.f32.mrf.mxu1  ;;  %v1902_v30 = vpack.c.bf16 %v1880_v21, %v1878_v50  ;;  %v1881_v57 = vmax.f32 %v1830_v41, 0.0  ;;  %v1723_v7 = vadd.f32 %v1722_v45, %v4003_v51  ;;  %v1834_v9 = vadd.f32 %v1833_v49, %v1721_v56  ;;  %v4334_v21 = vld [vmem:[#allocation18_spill] sm:$0xff]  ;;  %v4335_v41 = vld [vmem:[#allocation19_spill] sm:$0xff] }
 0x1e7   : > { %v1724_v60 = vpop.f32.mrf.mxu0  ;;  %v1634_v56 = vadd.f32 %v4335_v41, %v4334_v21  ;;  %v3445_v21 = vld [vmem:[#allocation10 + $0x20] sm:$0xff]  }
 0x1e8   : > { %v1837_v61 = vpop.f32.mrf.mxu1  ;;  %v1903_v12 = vpack.c.bf16 %v1881_v57, %v1879_v25  ;;  %v1725_v20 = vadd.f32 %v1724_v60, %v1612_v44  ;;  %v1836_v10 = vadd.f32 %v1835_v24, %v1723_v7  ;;  %v1882_v14 = vmax.f32 %v1834_v9, 0.0 }
 0x1e9   : > { %v1726_v27 = vpop.f32.mrf.mxu0 }
 0x1ea   : > { %v1839_v48 = vpop.f32.mrf.mxu1  ;;  %v1838_v29 = vadd.f32 %v1837_v61, %v1725_v20  ;;  %v1727_v52 = vadd.f32 %v1726_v27, %v1614_v11  ;;  %2109 = vmatprep.mubr.bf16.mxu0 %v1903_v12  ;;  %v1883_v13 = vmax.f32 %v1836_v10, 0.0  ;;  %v3437_v27 = vld [vmem:[#allocation8 + $0x20] sm:$0xff]   ;;  %v3439_v10 = vld [vmem:[#allocation8 + $0x10] sm:$0xff]  }
 0x1eb   : > { %v1730_v53 = vpop.f32.mrf.mxu0  ;;  %2110 = vmatmul.mubr.bf16.gmra.mxu0 %v1902_v30  ;;  %3013 = vmatprep.subr.bf16.mxu1 %v3437_v27 }
 0x1ec   : > { %v1843_v28 = vpop.f32.mrf.mxu1  ;;  %v1884_v15 = vmax.f32 %v1838_v29, 0.0  ;;  %v1840_v51 = vadd.f32 %v1839_v48, %v1727_v52  ;;  %v1731_v32 = vadd.f32 %v1730_v53, %v4013_v58  ;;  %3014 = vmatpush3.bf16.msra.mxu1 %v3437_v27  ;;  %v3438_v48 = vld [vmem:[#allocation8 + $0x18] sm:$0xff]   ;;  %v3440_v29 = vld [vmem:[#allocation8 + $0x8] sm:$0xff]   ;;  %v3441_v52 = vld [vmem:[#allocation8] sm:$0xff]  }
 0x1ed   : > { %v1732_v55 = vpop.f32.mrf.mxu0  ;;  %3015 = vmatprep.subr.bf16.mxu1 %v3438_v48  ;;  %v3442_v53 = vld [vmem:[#allocation10 + $0x38] sm:$0xff]  }
 0x1ee   : > { %v1845_v33 = vpop.f32.mrf.mxu1  ;;  %v1904_v17 = vpack.c.bf16 %v1884_v15, %v1882_v14  ;;  %v1885_v19 = vmax.f32 %v1840_v51, 0.0  ;;  %v1733_v31 = vadd.f32 %v1732_v55, %v4015_v3  ;;  %v1844_v63 = vadd.f32 %v1843_v28, %v1731_v32  ;;  %v4088_v51 = vld [vmem:[%s4301_s3] ss:$0 sm:$0xff] }
 0x1ef   : > { %v1734_v59 = vpop.f32.mrf.mxu0 }
 0x1f0   : > { %v1847_v34 = vpop.f32.mrf.mxu1  ;;  %v1905_v36 = vpack.c.bf16 %v1885_v19, %v1883_v13  ;;  %v1735_v62 = vadd.f32 %v1734_v59, %v1622_v54  ;;  %v1846_v40 = vadd.f32 %v1845_v33, %v1733_v31  ;;  %v1886_v37 = vmax.f32 %v1844_v63, 0.0  ;;  %3016 = vmatpush3.bf16.msra.mxu1 %v3438_v48 }
 0x1f1   : > { %v1736_v0 = vpop.f32.mrf.mxu0  ;;  %3017 = vmatprep.subr.bf16.mxu1 %v3439_v10 }
 0x1f2   : > { %v1849_v58 = vpop.f32.mrf.mxu1  ;;  %v1848_v1 = vadd.f32 %v1847_v34, %v1735_v62  ;;  %v1737_v4 = vadd.f32 %v1736_v0, %v1624_v35  ;;  %2117 = vmatprep.mubr.bf16.mxu0 %v1905_v36  ;;  %v1887_v38 = vmax.f32 %v1846_v40, 0.0 }
 0x1f3   : > { %v1740_v5 = vpop.f32.mrf.mxu0  ;;  %2118 = vmatmul.mubr.bf16.gmra.mxu0 %v1904_v17 }
 0x1f4   : > { %v1853_v2 = vpop.f32.mrf.mxu1  ;;  %v1888_v18 = vmax.f32 %v1848_v1, 0.0  ;;  %v1850_v3 = vadd.f32 %v1849_v58, %v1737_v4  ;;  %v1741_v39 = vadd.f32 %v1740_v5, %v4025_v16  ;;  %3018 = vmatpush3.bf16.msra.mxu1 %v3439_v10 }
 0x1f5   : > { %v1742_v8 = vpop.f32.mrf.mxu0  ;;  %3019 = vmatprep.subr.bf16.mxu1 %v3440_v29 }
 0x1f6   : > { %v1855_v22 = vpop.f32.mrf.mxu1  ;;  %v1906_v23 = vpack.c.bf16 %v1888_v18, %v1886_v37  ;;  %v1889_v47 = vmax.f32 %v1850_v3, 0.0  ;;  %v1743_v43 = vadd.f32 %v1742_v8, %v4333_v42  ;;  %v1854_v45 = vadd.f32 %v1853_v2, %v1741_v39  ;;  %v3443_v3 = vld [vmem:[#allocation10 + $0x30] sm:$0xff]  }
 0x1f7   : > { %v1744_v49 = vpop.f32.mrf.mxu0 }
 0x1f8   : > { %v1857_v50 = vpop.f32.mrf.mxu1  ;;  %v1907_v44 = vpack.c.bf16 %v1889_v47, %v1887_v38  ;;  %v1745_v24 = vadd.f32 %v1744_v49, %v1632_v6  ;;  %v1856_v16 = vadd.f32 %v1855_v22, %v1743_v43  ;;  %v1890_v7 = vmax.f32 %v1854_v45, 0.0  ;;  %3020 = vmatpush3.bf16.msra.mxu1 %v3440_v29  ;;  %v3444_v38 = vld [vmem:[#allocation10 + $0x28] sm:$0xff]  }
 0x1f9   : > { %v1746_v25 = vpop.f32.mrf.mxu0  ;;  %3021 = vmatprep.subr.bf16.mxu1 %v3441_v52 }
 0x1fa   : > { %v1858_v30 = vadd.f32 %v1857_v50, %v1745_v24  ;;  %v1747_v57 = vadd.f32 %v1746_v25, %v1634_v56  ;;  %2125 = vmatprep.mubr.bf16.mxu0 %v1907_v44  ;;  %v1859_v26 = vpop.f32.mrf.mxu1  ;;  %v1891_v11 = vmax.f32 %v1856_v16, 0.0  ;;  %v3446_v25 = vld [vmem:[#allocation10 + $0x18] sm:$0xff]  }
 0x1fb   : > { %2126 = vmatmul.mubr.bf16.gmra.mxu0 %v1906_v23 }
 0x1fc   : > { %v1892_v60 = vmax.f32 %v1858_v30, 0.0  ;;  %v1860_v61 = vadd.f32 %v1859_v26, %v1747_v57  ;;  %3022 = vmatpush3.bf16.msra.mxu1 %v3441_v52 }
 0x1fd   : > { %3039 = vmatprep.subr.bf16.mxu1 %v3442_v53 }
 0x1fe   : > { %v1908_v12 = vpack.c.bf16 %v1892_v60, %v1890_v7  ;;  %v1893_v9 = vmax.f32 %v1860_v61, 0.0 }
 0x200   : > { %v1909_v20 = vpack.c.bf16 %v1893_v9, %v1891_v11 }
 0x202   : > { %2133 = vmatprep.mubr.bf16.mxu0 %v1909_v20 }
 0x203   : > { %2134 = vmatmul.mubr.bf16.gmra.mxu0 %v1908_v12 }
 0x28b   : > { %v2927_v28 = vpop.f32.mrf.mxu0 }
 0x28d   : > { %v2928_v14 = vpop.f32.mrf.mxu0 }
 0x28e   : > { %v2929_v15 = vadd.f32 %v2928_v14, %v2927_v28 }
 0x28f   : > { %v2930_v32 = vpop.f32.mrf.mxu0 }
 0x290   : > { %v2080_v55 = vadd.f32 %v2929_v15, %v4088_v51 }
 0x291   : > { %v2931_v54 = vpop.f32.mrf.mxu0 }
 0x292   : > { %v2932_v33 = vadd.f32 %v2931_v54, %v2930_v32  ;;  %v2142_v31 = vmax.f32 %v2080_v55, 0.0 }
 0x293   : > { %v2933_v13 = vpop.f32.mrf.mxu0 }
 0x294   : > { %v2083_v17 = vadd.f32 %v2932_v33, %v4088_v51 }
 0x295   : > { %v2934_v19 = vpop.f32.mrf.mxu0 }
 0x296   : > { %v2143_v59 = vmax.f32 %v2083_v17, 0.0  ;;  %v2935_v34 = vadd.f32 %v2934_v19, %v2933_v13 }
 0x297   : > { %v2936_v35 = vpop.f32.mrf.mxu0 }
 0x298   : > { %v2158_v36 = vpack.c.bf16 %v2143_v59, %v2142_v31  ;;  %v2088_v62 = vadd.f32 %v2935_v34, %v4088_v51 }
 0x299   : > { %v2937_v63 = vpop.f32.mrf.mxu0 }
 0x29a   : > { %v2938_v0 = vadd.f32 %v2937_v63, %v2936_v35  ;;  %3023 = vmatprep.mubr.bf16.mxu1 %v2158_v36  ;;  %v2144_v4 = vmax.f32 %v2088_v62, 0.0 }
 0x29b   : > { %v2939_v58 = vpop.f32.mrf.mxu0 }
 0x29c   : > { %v2091_v40 = vadd.f32 %v2938_v0, %v4088_v51 }
 0x29d   : > { %v2940_v1 = vpop.f32.mrf.mxu0 }
 0x29e   : > { %v2145_v5 = vmax.f32 %v2091_v40, 0.0  ;;  %v2941_v2 = vadd.f32 %v2940_v1, %v2939_v58 }
 0x29f   : > { %v2942_v37 = vpop.f32.mrf.mxu0 }
 0x2a0   : > { %v2159_v18 = vpack.c.bf16 %v2145_v5, %v2144_v4  ;;  %v2096_v46 = vadd.f32 %v2941_v2, %v4088_v51 }
 0x2a1   : > { %v2943_v39 = vpop.f32.mrf.mxu0 }
 0x2a2   : > { %v2944_v6 = vadd.f32 %v2943_v39, %v2942_v37  ;;  %3024 = vmatmul.mubr.bf16.vlgmr.msra.gmra.mxu1 %v2159_v18  ;;  %v2146_v47 = vmax.f32 %v2096_v46, 0.0 }
 0x2a3   : > { %v2945_v8 = vpop.f32.mrf.mxu0  ;;  %3040 = vmatpush3.bf16.msra.mxu1 %v3442_v53 }
 0x2a4   : > { %v2099_v22 = vadd.f32 %v2944_v6, %v4088_v51  ;;  %3041 = vmatprep.subr.bf16.mxu1 %v3443_v3  ;;  %v3447_v6 = vld [vmem:[#allocation10 + $0x10] sm:$0xff]  }
 0x2a5   : > { %v2946_v23 = vpop.f32.mrf.mxu0 }
 0x2a6   : > { %v2147_v42 = vmax.f32 %v2099_v22, 0.0  ;;  %v2947_v43 = vadd.f32 %v2946_v23, %v2945_v8  ;;  %v3448_v8 = vld [vmem:[#allocation10 + $0x8] sm:$0xff]   ;;  %v3449_v22 = vld [vmem:[#allocation10] sm:$0xff]  }
 0x2a7   : > { %v2948_v49 = vpop.f32.mrf.mxu0  ;;  %3042 = vmatpush3.bf16.msra.mxu1 %v3443_v3 }
 0x2a8   : > { %v2160_v50 = vpack.c.bf16 %v2147_v42, %v2146_v47  ;;  %3043 = vmatprep.subr.bf16.mxu1 %v3444_v38  ;;  %v2104_v56 = vadd.f32 %v2947_v43, %v4088_v51  ;;  %v2887_v47 = vld [vmem:[%s4303_s5] ss:$0 sm:$0xff] }
 0x2a9   : > { %v2949_v41 = vpop.f32.mrf.mxu0 }
 0x2aa   : > { %v2950_v44 = vadd.f32 %v2949_v41, %v2948_v49  ;;  %3027 = vmatprep.mubr.bf16.mxu1 %v2160_v50  ;;  %v2148_v30 = vmax.f32 %v2104_v56, 0.0 }
 0x2ab   : > { %v2951_v45 = vpop.f32.mrf.mxu0  ;;  %3044 = vmatpush3.bf16.msra.mxu1 %v3444_v38 }
 0x2ac   : > { %v2107_v24 = vadd.f32 %v2950_v44, %v4088_v51  ;;  %3045 = vmatprep.subr.bf16.mxu1 %v3445_v21 }
 0x2ad   : > { %v2952_v16 = vpop.f32.mrf.mxu0 }
 0x2ae   : > { %v2149_v57 = vmax.f32 %v2107_v24, 0.0  ;;  %v2953_v26 = vadd.f32 %v2952_v16, %v2951_v45 }
 0x2af   : > { %v2954_v7 = vpop.f32.mrf.mxu0  ;;  %3046 = vmatpush3.bf16.msra.mxu1 %v3445_v21 }
 0x2b0   : > { %v2161_v60 = vpack.c.bf16 %v2149_v57, %v2148_v30  ;;  %3047 = vmatprep.subr.bf16.mxu1 %v3446_v25  ;;  %v2112_v11 = vadd.f32 %v2953_v26, %v4088_v51 }
 0x2b1   : > { %v2955_v61 = vpop.f32.mrf.mxu0 }
 0x2b2   : > { %v2956_v12 = vadd.f32 %v2955_v61, %v2954_v7  ;;  %3028 = vmatmul.mubr.bf16.gmra.mxu1 %v2161_v60  ;;  %v2150_v48 = vmax.f32 %v2112_v11, 0.0 }
 0x2b3   : > { %v2957_v9 = vpop.f32.mrf.mxu0  ;;  %3048 = vmatpush3.bf16.msra.mxu1 %v3446_v25 }
 0x2b4   : > { %v2115_v20 = vadd.f32 %v2956_v12, %v4088_v51  ;;  %3049 = vmatprep.subr.bf16.mxu1 %v3447_v6 }
 0x2b5   : > { %v2958_v27 = vpop.f32.mrf.mxu0 }
 0x2b6   : > { %v2151_v10 = vmax.f32 %v2115_v20, 0.0  ;;  %v2959_v29 = vadd.f32 %v2958_v27, %v2957_v9 }
 0x2b7   : > { %v2960_v52 = vpop.f32.mrf.mxu0  ;;  %3050 = vmatpush3.bf16.msra.mxu1 %v3447_v6 }
 0x2b8   : > { %v2162_v53 = vpack.c.bf16 %v2151_v10, %v2150_v48  ;;  %v2120_v14 = vadd.f32 %v2959_v29, %v4088_v51  ;;  %3051 = vmatprep.subr.bf16.mxu1 %v3448_v8 }
 0x2b9   : > { %v2961_v28 = vpop.f32.mrf.mxu0 }
 0x2ba   : > { %v2962_v15 = vadd.f32 %v2961_v28, %v2960_v52  ;;  %3031 = vmatprep.mubr.bf16.mxu1 %v2162_v53  ;;  %v2152_v33 = vmax.f32 %v2120_v14, 0.0 }
 0x2bb   : > { %v2963_v32 = vpop.f32.mrf.mxu0  ;;  %3052 = vmatpush3.bf16.msra.mxu1 %v3448_v8 }
 0x2bc   : > { %v2123_v54 = vadd.f32 %v2962_v15, %v4088_v51  ;;  %3053 = vmatprep.subr.bf16.mxu1 %v3449_v22 }
 0x2bd   : > { %v2964_v55 = vpop.f32.mrf.mxu0 }
 0x2be   : > { %v2153_v13 = vmax.f32 %v2123_v54, 0.0  ;;  %v2965_v17 = vadd.f32 %v2964_v55, %v2963_v32 }
 0x2bf   : > { %v2966_v19 = vpop.f32.mrf.mxu0  ;;  %3054 = vmatpush3.bf16.msra.mxu1 %v3449_v22 }
 0x2c0   : > { %v2163_v31 = vpack.c.bf16 %v2153_v13, %v2152_v33  ;;  %v2128_v34 = vadd.f32 %v2965_v17, %v4088_v51 }
 0x2c1   : > { %v2967_v59 = vpop.f32.mrf.mxu0 }
 0x2c2   : > { %v2968_v35 = vadd.f32 %v2967_v59, %v2966_v19  ;;  %3032 = vmatmul.mubr.bf16.gmra.mxu1 %v2163_v31  ;;  %v2154_v0 = vmax.f32 %v2128_v34, 0.0 }
 0x2c3   : > { %v2969_v36 = vpop.f32.mrf.mxu0 }
 0x2c4   : > { %v2131_v63 = vadd.f32 %v2968_v35, %v4088_v51 }
 0x2c5   : > { %v2970_v62 = vpop.f32.mrf.mxu0 }
 0x2c6   : > { %v2155_v58 = vmax.f32 %v2131_v63, 0.0  ;;  %v2971_v40 = vadd.f32 %v2970_v62, %v2969_v36 }
 0x2c7   : > { %v2972_v1 = vpop.f32.mrf.mxu0 }
 0x2c8   : > { %v2164_v4 = vpack.c.bf16 %v2155_v58, %v2154_v0  ;;  %v2136_v2 = vadd.f32 %v2971_v40, %v4088_v51 }
 0x2c9   : > { %v2973_v5 = vpop.f32.mrf.mxu0 }
 0x2ca   : > { %v2974_v37 = vadd.f32 %v2973_v5, %v2972_v1  ;;  %3035 = vmatprep.mubr.bf16.mxu1 %v2164_v4  ;;  %v2156_v3 = vmax.f32 %v2136_v2, 0.0 }
 0x2cc   : > { %v2139_v18 = vadd.f32 %v2974_v37, %v4088_v51 }
 0x2ce   : > { %v2157_v39 = vmax.f32 %v2139_v18, 0.0  ;;  %v2526_v18 = vlaneseq }
 0x2d0   : > { %v2165_v46 = vpack.c.bf16 %v2157_v39, %v2156_v3  ;;  %v4157_v3 = vand.u32 127, %v2526_v18  ;;  %v4163_v39 = vld [vmem:[%s4305_s7] ss:$0 sm:$0xff] }
 0x2d2   : > { %3036 = vmatmul.mubr.bf16.gmra.mxu1 %v2165_v46  ;;  %vm2528_vm0 = vcmp.lt.s32.totalorder %v4157_v3, 10 }
 0x362   : > { %v3025_v38 = vpop.f32.mrf.mxu1 }
 0x363   : > { %v4113_v49 = vadd.f32 %v3025_v38, %v2887_v47 }
 0x364   : > { %v2271_v23 = vpop.f32.mrf.mxu1 }
 0x365   : > { %v4109_v42 = vadd.f32 %v2887_v47, %v2271_v23  ;;  %v2336_v45 = vmax.f32 %v4113_v49, 0.0 }
 0x366   : > { %v3026_v51 = vpop.f32.mrf.mxu1 }
 0x367   : > { %v4111_v43 = vadd.f32 %v3026_v51, %v2887_v47  ;;  %v2334_v56 = vmax.f32 %v4109_v42, 0.0 }
 0x368   : > { %v2274_v50 = vpop.f32.mrf.mxu1 }
 0x369   : > { %v4115_v21 = vadd.f32 %v2887_v47, %v2274_v50  ;;  %v2337_v41 = vmax.f32 %v4111_v43, 0.0 }
 0x36b   : > { %v2335_v44 = vmax.f32 %v4115_v21, 0.0  ;;  %v2351_v25 = vpack.c.bf16 %v2337_v41, %v2336_v45 }
 0x36d   : > { %v2350_v24 = vpack.c.bf16 %v2335_v44, %v2334_v56 }
 0x36f   : > { %3055 = vmatprep.mubr.bf16.mxu1 %v2350_v24 }
 0x370   : > { %3056 = vmatmul.mubr.bf16.vlgmr.msra.gmra.mxu1 %v2351_v25 }
 0x372   : > { %v3029_v16 = vpop.f32.mrf.mxu1 }
 0x373   : > { %v4125_v60 = vadd.f32 %v3029_v16, %v2887_v47 }
 0x374   : > { %v2287_v30 = vpop.f32.mrf.mxu1 }
 0x375   : > { %v4121_v26 = vadd.f32 %v2887_v47, %v2287_v30  ;;  %v2340_v27 = vmax.f32 %v4125_v60, 0.0 }
 0x376   : > { %v3030_v57 = vpop.f32.mrf.mxu1 }
 0x377   : > { %v4123_v7 = vadd.f32 %v3030_v57, %v2887_v47  ;;  %v2338_v9 = vmax.f32 %v4121_v26, 0.0 }
 0x378   : > { %v2290_v61 = vpop.f32.mrf.mxu1 }
 0x379   : > { %v4127_v11 = vadd.f32 %v2887_v47, %v2290_v61  ;;  %v2341_v12 = vmax.f32 %v4123_v7, 0.0 }
 0x37b   : > { %v2339_v20 = vmax.f32 %v4127_v11, 0.0  ;;  %v2353_v10 = vpack.c.bf16 %v2341_v12, %v2340_v27 }
 0x37d   : > { %v2352_v48 = vpack.c.bf16 %v2339_v20, %v2338_v9 }
 0x37f   : > { %3059 = vmatprep.mubr.bf16.mxu1 %v2352_v48 }
 0x380   : > { %3060 = vmatmul.mubr.bf16.gmra.mxu1 %v2353_v10 }
 0x382   : > { %v3033_v29 = vpop.f32.mrf.mxu1 }
 0x383   : > { %v4137_v15 = vadd.f32 %v3033_v29, %v2887_v47 }
 0x384   : > { %v2303_v52 = vpop.f32.mrf.mxu1 }
 0x385   : > { %v4133_v28 = vadd.f32 %v2887_v47, %v2303_v52  ;;  %v2344_v17 = vmax.f32 %v4137_v15, 0.0 }
 0x386   : > { %v3034_v53 = vpop.f32.mrf.mxu1 }
 0x387   : > { %v4135_v14 = vadd.f32 %v3034_v53, %v2887_v47  ;;  %v2342_v33 = vmax.f32 %v4133_v28, 0.0 }
 0x388   : > { %v2306_v32 = vpop.f32.mrf.mxu1 }
 0x389   : > { %v4139_v54 = vadd.f32 %v2887_v47, %v2306_v32  ;;  %v2345_v55 = vmax.f32 %v4135_v14, 0.0 }
 0x38b   : > { %v2343_v13 = vmax.f32 %v4139_v54, 0.0  ;;  %v2355_v31 = vpack.c.bf16 %v2345_v55, %v2344_v17 }
 0x38d   : > { %v2354_v19 = vpack.c.bf16 %v2343_v13, %v2342_v33 }
 0x38f   : > { %3063 = vmatprep.mubr.bf16.mxu1 %v2354_v19 }
 0x390   : > { %3064 = vmatmul.mubr.bf16.gmra.mxu1 %v2355_v31 }
 0x392   : > { %v3037_v59 = vpop.f32.mrf.mxu1 }
 0x393   : > { %v4149_v62 = vadd.f32 %v3037_v59, %v2887_v47 }
 0x394   : > { %v2319_v34 = vpop.f32.mrf.mxu1 }
 0x395   : > { %v4145_v36 = vadd.f32 %v2887_v47, %v2319_v34  ;;  %v2348_v5 = vmax.f32 %v4149_v62, 0.0 }
 0x396   : > { %v3038_v35 = vpop.f32.mrf.mxu1 }
 0x397   : > { %v4147_v63 = vadd.f32 %v3038_v35, %v2887_v47  ;;  %v2346_v1 = vmax.f32 %v4145_v36, 0.0 }
 0x398   : > { %v2322_v0 = vpop.f32.mrf.mxu1 }
 0x399   : > { %v4151_v58 = vadd.f32 %v2887_v47, %v2322_v0  ;;  %v2349_v40 = vmax.f32 %v4147_v63, 0.0 }
 0x39b   : > { %v2347_v4 = vmax.f32 %v4151_v58, 0.0  ;;  %v2357_v37 = vpack.c.bf16 %v2349_v40, %v2348_v5 }
 0x39d   : > { %v2356_v2 = vpack.c.bf16 %v2347_v4, %v2346_v1 }
 0x39f   : > { %3067 = vmatprep.mubr.bf16.mxu1 %v2356_v2 }
 0x3a0   : > { %3068 = vmatmul.mubr.bf16.gmra.mxu1 %v2357_v37 }
 0x430   : > { %v3057_v46 = vpop.f32.mrf.mxu1 }
 0x431   : > { %v2472_v6 = vadd.f32 %v3057_v46, %v4163_v39 }
 0x432   : > { %v2463_v8 = vpop.f32.mrf.mxu1 }
 0x433   : > { %v2531_v22 = vsel %vm2528_vm0, %v4113_v49, %v2472_v6  ;;  %v2464_v38 = vadd.f32 %v4163_v39, %v2463_v8 }
 0x434   : > { %2547 = vst [vmem:[%s4171_s24 + $0x10] sm:$0xff] %v2531_v22  ;;  %v3058_v23 = vpop.f32.mrf.mxu1 }
 0x435   : > { %v2529_v47 = vsel %vm2528_vm0, %v4109_v42, %v2464_v38  ;;  %v2475_v51 = vadd.f32 %v3058_v23, %v4163_v39 }
 0x436   : > { %2545 = vst [vmem:[%s4171_s24] sm:$0xff] %v2529_v47  ;;  %v2466_v49 = vpop.f32.mrf.mxu1 }
 0x437   : > { %v2532_v50 = vsel %vm2528_vm0, %v4111_v43, %v2475_v51  ;;  %v2467_v41 = vadd.f32 %v4163_v39, %v2466_v49 }
 0x438   : > { %2548 = vst [vmem:[%s4171_s24 + $0x18] sm:$0xff] %v2532_v50 }
 0x439   : > { %v2530_v56 = vsel %vm2528_vm0, %v4115_v21, %v2467_v41 }
 0x43a   : > { %2546 = vst [vmem:[%s4171_s24 + $0x8] sm:$0xff] %v2530_v56 }
 0x440   : > { %v3061_v42 = vpop.f32.mrf.mxu1 }
 0x441   : > { %v2488_v44 = vadd.f32 %v3061_v42, %v4163_v39 }
 0x442   : > { %v2479_v45 = vpop.f32.mrf.mxu1 }
 0x443   : > { %v2535_v24 = vsel %vm2528_vm0, %v4125_v60, %v2488_v44  ;;  %v2480_v43 = vadd.f32 %v4163_v39, %v2479_v45 }
 0x444   : > { %2551 = vst [vmem:[%s4171_s24 + $0x30] sm:$0xff] %v2535_v24  ;;  %v3062_v25 = vpop.f32.mrf.mxu1 }
 0x445   : > { %v2533_v16 = vsel %vm2528_vm0, %v4121_v26, %v2480_v43  ;;  %v2491_v21 = vadd.f32 %v3062_v25, %v4163_v39 }
 0x446   : > { %2549 = vst [vmem:[%s4171_s24 + $0x20] sm:$0xff] %v2533_v16  ;;  %v2482_v30 = vpop.f32.mrf.mxu1 }
 0x447   : > { %v2536_v57 = vsel %vm2528_vm0, %v4123_v7, %v2491_v21  ;;  %v2483_v60 = vadd.f32 %v4163_v39, %v2482_v30 }
 0x448   : > { %2552 = vst [vmem:[%s4171_s24 + $0x38] sm:$0xff] %v2536_v57 }
 0x449   : > { %v2534_v61 = vsel %vm2528_vm0, %v4127_v11, %v2483_v60 }
 0x44a   : > { %2550 = vst [vmem:[%s4171_s24 + $0x28] sm:$0xff] %v2534_v61 }
 0x450   : > { %v3065_v26 = vpop.f32.mrf.mxu1 }
 0x451   : > { %v2504_v12 = vadd.f32 %v3065_v26, %v4163_v39 }
 0x452   : > { %v2495_v9 = vpop.f32.mrf.mxu1 }
 0x453   : > { %v2539_v20 = vsel %vm2528_vm0, %v4137_v15, %v2504_v12  ;;  %v2496_v7 = vadd.f32 %v4163_v39, %v2495_v9 }
 0x454   : > { %2555 = vst [vmem:[%s4171_s24 + $0x50] sm:$0xff] %v2539_v20  ;;  %v3066_v27 = vpop.f32.mrf.mxu1 }
 0x455   : > { %v2537_v48 = vsel %vm2528_vm0, %v4133_v28, %v2496_v7  ;;  %v2507_v11 = vadd.f32 %v3066_v27, %v4163_v39 }
 0x456   : > { %2553 = vst [vmem:[%s4171_s24 + $0x40] sm:$0xff] %v2537_v48  ;;  %v2498_v10 = vpop.f32.mrf.mxu1 }
 0x457   : > { %v2540_v29 = vsel %vm2528_vm0, %v4135_v14, %v2507_v11  ;;  %v2499_v52 = vadd.f32 %v4163_v39, %v2498_v10 }
 0x458   : > { %2556 = vst [vmem:[%s4171_s24 + $0x58] sm:$0xff] %v2540_v29 }
 0x459   : > { %v2538_v53 = vsel %vm2528_vm0, %v4139_v54, %v2499_v52 }
 0x45a   : > { %2554 = vst [vmem:[%s4171_s24 + $0x48] sm:$0xff] %v2538_v53 }
 0x460   : > { %v3069_v28 = vpop.f32.mrf.mxu1 }
 0x461   : > { %v2520_v15 = vadd.f32 %v3069_v28, %v4163_v39 }
 0x462   : > { %v2511_v32 = vpop.f32.mrf.mxu1 }
 0x463   : > { %v2543_v55 = vsel %vm2528_vm0, %v4149_v62, %v2520_v15  ;;  %v2512_v14 = vadd.f32 %v4163_v39, %v2511_v32 }
 0x464   : > { %2559 = vst [vmem:[%s4171_s24 + $0x70] sm:$0xff] %v2543_v55  ;;  %v3070_v33 = vpop.f32.mrf.mxu1 }
 0x465   : > { %v2541_v54 = vsel %vm2528_vm0, %v4145_v36, %v2512_v14  ;;  %v2523_v13 = vadd.f32 %v3070_v33, %v4163_v39 }
 0x466   : > { %2557 = vst [vmem:[%s4171_s24 + $0x60] sm:$0xff] %v2541_v54  ;;  %v2514_v17 = vpop.f32.mrf.mxu1 }
 0x467   : > { %v2544_v19 = vsel %vm2528_vm0, %v4147_v63, %v2523_v13  ;;  %v2515_v31 = vadd.f32 %v4163_v39, %v2514_v17 }
 0x468   : > { %2560 = vst [vmem:[%s4171_s24 + $0x78] sm:$0xff] %v2544_v19 }
 0x469   : > { %v2542_v59 = vsel %vm2528_vm0, %v4151_v58, %v2515_v31 }
 0x46a   : > { %2558 = vst [vmem:[%s4171_s24 + $0x68] sm:$0xff] %v2542_v59 }
 0x46b   : > { %3595 = shalt.err (!%p3592_p10)
}
 0x46c   : > { %s3596_s23 = scalar_lea.hbm %s4248_s9, 2048  ;;  %s3600_s21 = scalar_lea.hbm %s4306_s8, 4096 }
 0x46d   : > { %p3597_p13 = scmp.ne.s32.totalorder %s4248_s9, %s3596_s23  ;;  %p3601_p8 = scmp.lt.s32.totalorder %s4248_s9, %s4306_s8 }
 0x46e   : > { %p3602_p5 = scmp.lt.s32.totalorder %s3600_s21, %s3596_s23 }
 0x46f   : > { %p3598_p4 = pnand %p3597_p13, %p4336_p0 }
 0x470   : > { %p3603_p11 = por %p3602_p5, %p3601_p8 }
 0x471   : > { %p3599_p6 = pneg %p3598_p4 }
 0x473   : > { %p3604_p12 = pnand %p3603_p11, %p3599_p6 }
 0x475   : > { %3607 = shalt.err (!%p3604_p12)
}
 0x476   : > { %s3669_s16 = smov 128   ;;  %s3670_s10 = smov 8  }
 0x477   : > { %3092 = dma.vmem_to_hbm [thread:$0]  (%p4336_p0), %s4250_s2, 2048, %s4248_s9, %s2562_s22, %s3669_s16, %s3669_s16, %s3670_s10  }
 0x478 PF: > { %s2590_s20 = sand.u32 1, %s3642_s27   ;;  %p4337_p2 = scmp.ne.s32.totalorder %s4314_s12, 0 }
 0x479   : > { %p4338_p3 = scmp.ge.s32.totalorder %s3654_s30, 2  ;;  %s2591_s11 = scalar_lea.sflag [#allocation4], %s2590_s20 }
 0x47b   : > { %p3112_p7 = pnand %p4338_p3, %p4337_p2 }
 0x47d   : > { %p3113_p9 = pneg %p3112_p7 }
 0x47f   : > { %3637 = dma.done.wait (%p3113_p9), %s2591_s11, 2048  }
 0x480   : > { %3639 = vsyncadd (%p3113_p9), %s2591_s11, 4294965248  ;;  %p23_p1 = scmp.ge.s32.totalorder %s3804_s25, 4   ;;  %s4339_s27 = smov %s3646_s28 }
 0x481   : > { %s4340_s28 = smov %s3650_s29  ;;  %s4341_s29 = smov %s3820_s19 }
 0x482   : > { %s4342_s30 = smov %s3804_s25  ;;  %25 = sbr.rel (!%p23_p1) target bundleno = 10 (0xa), region = 113 }
 0x487   :  { %2596 = vsyncpa [#allocation3], 1 }
 0x488   :  { %2598 = vsyncpa [#allocation3 + $0x1], 1 }
 0x489   :  { %2599 = vsyncpa [#allocation6], 1 }
 0x48a   :  { %2600 = vsyncpa [#allocation9], 1 }
 0x48b   :  { %2601 = vsyncpa [#allocation4], 1 }
 0x48c   :  { %2603 = vsyncpa [#allocation4 + $0x1], 1 }

</bundles_post_ra>
